<compile_context>
chip_gen: v6e
topology: v6e:2x2x1
jax: 0.10.0
libtpu: 0.0.40
codegen_flags: <defaults>
</compile_context>

<pallas_src>
import math

import jax
import jax.numpy as jnp
import numpy as np
from jax.experimental import pallas as pl
from jax.experimental.pallas import tpu as pltpu


def _mha_kernel(q_ref, h_ref, wq_ref, wk_ref, wv_ref, wo_ref, out_ref):
    TB, nq, D = q_ref.shape
    _, gs, _ = h_ref.shape
    H, _, kd = wq_ref.shape
    vd = wv_ref.shape[-1]
    E = out_ref.shape[-1]
    norm_factor = 1.0 / math.sqrt(kd)
    f32 = jnp.float32

    # Flatten the batch tile into rows: big sublane fill for the projections.
    qf = q_ref[...].reshape(TB * nq, D)     # (TB*nq, D)
    hf = h_ref[...].reshape(TB * gs, D)     # (TB*gs, D)

    # Per-head projections + QK^T.  Heads indexed on the leading (cheap) ref
    # axis -> no lane extracts.  Statically unrolled (H is small & static).
    compat_tiles = []
    v_tiles = []
    for hd in range(H):
        Qh = jnp.dot(qf, wq_ref[hd], preferred_element_type=f32) * norm_factor  # (TB*nq, kd)
        Kh = jnp.dot(hf, wk_ref[hd], preferred_element_type=f32)                # (TB*gs, kd)
        Vh = jnp.dot(hf, wv_ref[hd], preferred_element_type=f32)                # (TB*gs, vd)
        # Batched Q @ K^T over the batch tile; contracts last dims, so no
        # explicit K transpose is materialized.
        compat_tiles.append(
            jnp.einsum('bqd,bkd->bqk',
                       Qh.reshape(TB, nq, kd), Kh.reshape(TB, gs, kd),
                       preferred_element_type=f32))                             # (TB, nq, gs)
        v_tiles.append(Vh.reshape(TB, gs, vd))

    # ONE numerically-stable softmax over every (head, batch-tile) pair.
    compat = jnp.concatenate(compat_tiles, axis=0)          # (H*TB, nq, gs)
    compat = compat - jnp.max(compat, axis=-1, keepdims=True)
    e = jnp.exp(compat)
    denom = jnp.sum(e, axis=-1, keepdims=True)
    inv = pl.reciprocal(denom, approx=True)                  # EUP vrcp (free slot)
    inv = inv * (2.0 - denom * inv)                          # one Newton step -> ~f32 accuracy
    attn = e * inv                                           # (H*TB, nq, gs)

    # attn @ V and the output projection, accumulated per head (no lane concat;
    # equivalent to PyTorch's head-major view(-1, H*vd) @ W_out.view(-1, E)).
    acc = jnp.zeros((TB * nq, E), f32)
    for hd in range(H):
        attn_h = attn[hd * TB:(hd + 1) * TB]                 # leading-axis slice, cheap
        head = jnp.einsum('bqk,bkv->bqv', attn_h, v_tiles[hd],
                          preferred_element_type=f32)        # (TB, nq, vd)
        acc = acc + jnp.dot(head.reshape(TB * nq, vd), wo_ref[hd],
                            preferred_element_type=f32)      # (TB*nq, E)

    out_ref[...] = acc.reshape(TB, nq, E).astype(out_ref.dtype)


def multi_head_attention(q, h, W_query, W_key, W_val, W_out, *, batch_tile=None):
    """q: (B, n_query, D), h: (B, graph_size, D). Returns (B, n_query, embed_dim)."""
    B, n_query, input_dim = q.shape
    _, graph_size, _ = h.shape
    n_heads, _, key_dim = W_query.shape
    val_dim = W_val.shape[-1]
    embed_dim = W_out.shape[-1]

    # Batch tile: as large as possible (amortize per-step overhead, fill MXU
    # sublanes) while keeping >=2 grid steps when B >= 2 so the "parallel" axis
    # feeds both v7x TensorCores.  At these block sizes the double-buffered
    # q/h/out tiles + resident weights are far under v7x's 64 MiB VMEM cap.
    if batch_tile is None:
        batch_tile = 1 if B <= 1 else min(8, (B + 1) // 2)
    tb = max(1, min(batch_tile, B))

    num_steps = (B + tb - 1) // tb
    b_pad = num_steps * tb
    if b_pad != B:
        pad = b_pad - B
        q = jnp.pad(q, ((0, pad), (0, 0), (0, 0)))
        h = jnp.pad(h, ((0, pad), (0, 0), (0, 0)))

    out = pl.pallas_call(
        _mha_kernel,
        out_shape=jax.ShapeDtypeStruct((b_pad, n_query, embed_dim), q.dtype),
        grid_spec=pltpu.PrefetchScalarGridSpec(
            num_scalar_prefetch=0,
            grid=(num_steps,),
            in_specs=[
                pl.BlockSpec((tb, n_query, input_dim), lambda i: (i, 0, 0)),
                pl.BlockSpec((tb, graph_size, input_dim), lambda i: (i, 0, 0)),
                # Weights: full-array, grid-invariant blocks (VMEM-resident
                # across the batch grid), native PyTorch layouts.
                pl.BlockSpec((n_heads, input_dim, key_dim), lambda i: (0, 0, 0)),
                pl.BlockSpec((n_heads, input_dim, key_dim), lambda i: (0, 0, 0)),
                pl.BlockSpec((n_heads, input_dim, val_dim), lambda i: (0, 0, 0)),
                pl.BlockSpec((n_heads, val_dim, embed_dim), lambda i: (0, 0, 0)),
            ],
            out_specs=pl.BlockSpec((tb, n_query, embed_dim), lambda i: (i, 0, 0)),
        ),
        compiler_params=pltpu.CompilerParams(
            dimension_semantics=("parallel",)),
    )(q, h, W_query, W_key, W_val, W_out)

    return out[:B] if b_pad != B else out


def _reference(q, h, W_query, W_key, W_val, W_out):
    """Pure-JAX reference mirroring the PyTorch forward (mask=None)."""
    n_heads, input_dim, key_dim = W_query.shape
    val_dim = W_val.shape[-1]
    embed_dim = W_out.shape[-1]
    B, n_query, _ = q.shape
    _, graph_size, _ = h.shape
    norm_factor = 1.0 / math.sqrt(key_dim)

    qflat = q.reshape(-1, input_dim)
    hflat = h.reshape(-1, input_dim)
    Q = jnp.matmul(qflat, W_query).reshape(n_heads, B, n_query, key_dim)
    K = jnp.matmul(hflat, W_key).reshape(n_heads, B, graph_size, key_dim)
    V = jnp.matmul(hflat, W_val).reshape(n_heads, B, graph_size, val_dim)
    compat = norm_factor * jnp.matmul(Q, jnp.swapaxes(K, 2, 3))
    attn = jax.nn.softmax(compat, axis=-1)
    heads = jnp.matmul(attn, V)  # (n_heads, B, n_query, val_dim)
    out = jnp.matmul(
        jnp.transpose(heads, (1, 2, 0, 3)).reshape(-1, n_heads * val_dim),
        W_out.reshape(-1, embed_dim),
    ).reshape(B, n_query, embed_dim)
    return out


if __name__ == "__main__":
    # Small shapes consistent with the module's forward.
    n_heads = 4
    input_dim = 32
    embed_dim = 32
    key_dim = embed_dim // n_heads   # 8
    val_dim = embed_dim // n_heads   # 8
    n_query = 8
    graph_size = 10

    key = jax.random.PRNGKey(0)
    k_q, k_h, k_wq, k_wk, k_wv, k_wo = jax.random.split(key, 6)

    # Deterministic parameter init matching init_parameters(): U(-1/sqrt(last_dim), +)
    def uinit(k, shape):
        stdv = 1.0 / math.sqrt(shape[-1])
        return jax.random.uniform(k, shape, jnp.float32, minval=-stdv, maxval=stdv)

    W_query = uinit(k_wq, (n_heads, input_dim, key_dim))
    W_key = uinit(k_wk, (n_heads, input_dim, key_dim))
    W_val = uinit(k_wv, (n_heads, input_dim, val_dim))
    W_out = uinit(k_wo, (n_heads, val_dim, embed_dim))

    # Case 1: B divides the batch tile evenly (TB=2, grid=(2,)).
    B = 4
    q = jax.random.normal(k_q, (B, n_query, input_dim), jnp.float32)
    h = jax.random.normal(k_h, (B, graph_size, input_dim), jnp.float32)
    out = jax.block_until_ready(multi_head_attention(q, h, W_query, W_key, W_val, W_out))
    ref = _reference(q, h, W_query, W_key, W_val, W_out)
    np.testing.assert_allclose(np.asarray(out), np.asarray(ref), rtol=1e-4, atol=1e-4)

    # Case 2: ragged batch exercising the padding path (B=3 -> TB=2, padded to 4).
    B2 = 3
    q2 = q[:B2]
    h2 = h[:B2]
    out2 = jax.block_until_ready(multi_head_attention(q2, h2, W_query, W_key, W_val, W_out))
    ref2 = _reference(q2, h2, W_query, W_key, W_val, W_out)
    np.testing.assert_allclose(np.asarray(out2), np.asarray(ref2), rtol=1e-4, atol=1e-4)

    print("KERNEL_OK")
</pallas_src>

<mosaic_0001>
module attributes {stable_mosaic.version = 11 : i64} {
  func.func @_mha_kernel(%arg0: i32, %arg1: memref<2x8x32xf32, #tpu.memory_space<vmem>>, %arg2: memref<2x10x32xf32, #tpu.memory_space<vmem>>, %arg3: memref<4x32x8xf32, #tpu.memory_space<vmem>>, %arg4: memref<4x32x8xf32, #tpu.memory_space<vmem>>, %arg5: memref<4x32x8xf32, #tpu.memory_space<vmem>>, %arg6: memref<4x8x32xf32, #tpu.memory_space<vmem>>, %arg7: memref<2x8x32xf32, #tpu.memory_space<vmem>>) attributes {dimension_semantics = [#tpu.dimension_semantics<parallel>], iteration_bounds = array<i64: 2>, scalar_prefetch = 0 : i64, scratch_operands = 0 : i64, tpu.core_type = #tpu.core_type<tc>, window_params = [{transform_indices = @transform_0, window_bounds = array<i64: 2, 8, 32>}, {transform_indices = @transform_1, window_bounds = array<i64: 2, 10, 32>}, {pipeline_mode = #tpu.pipeline_mode<synchronous>, transform_indices = @transform_2, window_bounds = array<i64: 4, 32, 8>}, {pipeline_mode = #tpu.pipeline_mode<synchronous>, transform_indices = @transform_3, window_bounds = array<i64: 4, 32, 8>}, {pipeline_mode = #tpu.pipeline_mode<synchronous>, transform_indices = @transform_4, window_bounds = array<i64: 4, 32, 8>}, {pipeline_mode = #tpu.pipeline_mode<synchronous>, transform_indices = @transform_5, window_bounds = array<i64: 4, 8, 32>}, {transform_indices = @transform_6, window_bounds = array<i64: 2, 8, 32>}]} {
    %c0 = arith.constant 0 : index
    %c0_0 = arith.constant 0 : index
    %c0_1 = arith.constant 0 : index
    %0 = vector.load %arg1[%c0, %c0_0, %c0_1] : memref<2x8x32xf32, #tpu.memory_space<vmem>>, vector<2x8x32xf32>
    %1 = vector.shape_cast %0 : vector<2x8x32xf32> to vector<16x32xf32>
    %c0_2 = arith.constant 0 : index
    %c0_3 = arith.constant 0 : index
    %c0_4 = arith.constant 0 : index
    %2 = vector.load %arg2[%c0_2, %c0_3, %c0_4] : memref<2x10x32xf32, #tpu.memory_space<vmem>>, vector<2x10x32xf32>
    %3 = vector.shape_cast %2 : vector<2x10x32xf32> to vector<20x32xf32>
    %c0_5 = arith.constant 0 : index
    %c0_6 = arith.constant 0 : index
    %c0_7 = arith.constant 0 : index
    %4 = vector.load %arg3[%c0_5, %c0_6, %c0_7] : memref<4x32x8xf32, #tpu.memory_space<vmem>>, vector<1x32x8xf32>
    %5 = vector.shape_cast %4 : vector<1x32x8xf32> to vector<32x8xf32>
    %cst = arith.constant dense<0.000000e+00> : vector<16x8xf32>
    %6 = tpu.matmul %1, %5, %cst {dimension_numbers = #tpu.dot_dimension_numbers<[1], [0], [0], [1], [0, 0, 1, 1], [], []>} : vector<16x32xf32>, vector<32x8xf32>, vector<16x8xf32> -> vector<16x8xf32>
    %cst_8 = arith.constant 0.353553385 : f32
    %7 = vector.broadcast %cst_8 : f32 to vector<16x8xf32>
    %8 = arith.mulf %6, %7 : vector<16x8xf32>
    %c0_9 = arith.constant 0 : index
    %c0_10 = arith.constant 0 : index
    %c0_11 = arith.constant 0 : index
    %9 = vector.load %arg4[%c0_9, %c0_10, %c0_11] : memref<4x32x8xf32, #tpu.memory_space<vmem>>, vector<1x32x8xf32>
    %10 = vector.shape_cast %9 : vector<1x32x8xf32> to vector<32x8xf32>
    %cst_12 = arith.constant dense<0.000000e+00> : vector<20x8xf32>
    %11 = tpu.matmul %3, %10, %cst_12 {dimension_numbers = #tpu.dot_dimension_numbers<[1], [0], [0], [1], [0, 0, 1, 1], [], []>} : vector<20x32xf32>, vector<32x8xf32>, vector<20x8xf32> -> vector<20x8xf32>
    %c0_13 = arith.constant 0 : index
    %c0_14 = arith.constant 0 : index
    %c0_15 = arith.constant 0 : index
    %12 = vector.load %arg5[%c0_13, %c0_14, %c0_15] : memref<4x32x8xf32, #tpu.memory_space<vmem>>, vector<1x32x8xf32>
    %13 = vector.shape_cast %12 : vector<1x32x8xf32> to vector<32x8xf32>
    %cst_16 = arith.constant dense<0.000000e+00> : vector<20x8xf32>
    %14 = tpu.matmul %3, %13, %cst_16 {dimension_numbers = #tpu.dot_dimension_numbers<[1], [0], [0], [1], [0, 0, 1, 1], [], []>} : vector<20x32xf32>, vector<32x8xf32>, vector<20x8xf32> -> vector<20x8xf32>
    %15 = vector.shape_cast %8 : vector<16x8xf32> to vector<2x8x8xf32>
    %16 = vector.shape_cast %11 : vector<20x8xf32> to vector<2x10x8xf32>
    "tpu.trace_start"() <{level = 10 : i32, message = "bqd,bkd->bqk"}> : () -> ()
    %cst_17 = arith.constant dense<0.000000e+00> : vector<2x8x10xf32>
    %17 = tpu.matmul %15, %16, %cst_17 {dimension_numbers = #tpu.dot_dimension_numbers<[2], [2], [1], [1], [0, 0, 0, 1, 1, 1], [0], [0]>} : vector<2x8x8xf32>, vector<2x10x8xf32>, vector<2x8x10xf32> -> vector<2x8x10xf32>
    "tpu.trace_stop"() : () -> ()
    %18 = vector.shape_cast %14 : vector<20x8xf32> to vector<2x10x8xf32>
    %c1 = arith.constant 1 : index
    %c0_18 = arith.constant 0 : index
    %c0_19 = arith.constant 0 : index
    %19 = vector.load %arg3[%c1, %c0_18, %c0_19] : memref<4x32x8xf32, #tpu.memory_space<vmem>>, vector<1x32x8xf32>
    %20 = vector.shape_cast %19 : vector<1x32x8xf32> to vector<32x8xf32>
    %cst_20 = arith.constant dense<0.000000e+00> : vector<16x8xf32>
    %21 = tpu.matmul %1, %20, %cst_20 {dimension_numbers = #tpu.dot_dimension_numbers<[1], [0], [0], [1], [0, 0, 1, 1], [], []>} : vector<16x32xf32>, vector<32x8xf32>, vector<16x8xf32> -> vector<16x8xf32>
    %cst_21 = arith.constant 0.353553385 : f32
    %22 = vector.broadcast %cst_21 : f32 to vector<16x8xf32>
    %23 = arith.mulf %21, %22 : vector<16x8xf32>
    %c1_22 = arith.constant 1 : index
    %c0_23 = arith.constant 0 : index
    %c0_24 = arith.constant 0 : index
    %24 = vector.load %arg4[%c1_22, %c0_23, %c0_24] : memref<4x32x8xf32, #tpu.memory_space<vmem>>, vector<1x32x8xf32>
    %25 = vector.shape_cast %24 : vector<1x32x8xf32> to vector<32x8xf32>
    %cst_25 = arith.constant dense<0.000000e+00> : vector<20x8xf32>
    %26 = tpu.matmul %3, %25, %cst_25 {dimension_numbers = #tpu.dot_dimension_numbers<[1], [0], [0], [1], [0, 0, 1, 1], [], []>} : vector<20x32xf32>, vector<32x8xf32>, vector<20x8xf32> -> vector<20x8xf32>
    %c1_26 = arith.constant 1 : index
    %c0_27 = arith.constant 0 : index
    %c0_28 = arith.constant 0 : index
    %27 = vector.load %arg5[%c1_26, %c0_27, %c0_28] : memref<4x32x8xf32, #tpu.memory_space<vmem>>, vector<1x32x8xf32>
    %28 = vector.shape_cast %27 : vector<1x32x8xf32> to vector<32x8xf32>
    %cst_29 = arith.constant dense<0.000000e+00> : vector<20x8xf32>
    %29 = tpu.matmul %3, %28, %cst_29 {dimension_numbers = #tpu.dot_dimension_numbers<[1], [0], [0], [1], [0, 0, 1, 1], [], []>} : vector<20x32xf32>, vector<32x8xf32>, vector<20x8xf32> -> vector<20x8xf32>
    %30 = vector.shape_cast %23 : vector<16x8xf32> to vector<2x8x8xf32>
    %31 = vector.shape_cast %26 : vector<20x8xf32> to vector<2x10x8xf32>
    "tpu.trace_start"() <{level = 10 : i32, message = "bqd,bkd->bqk"}> : () -> ()
    %cst_30 = arith.constant dense<0.000000e+00> : vector<2x8x10xf32>
    %32 = tpu.matmul %30, %31, %cst_30 {dimension_numbers = #tpu.dot_dimension_numbers<[2], [2], [1], [1], [0, 0, 0, 1, 1, 1], [0], [0]>} : vector<2x8x8xf32>, vector<2x10x8xf32>, vector<2x8x10xf32> -> vector<2x8x10xf32>
    "tpu.trace_stop"() : () -> ()
    %33 = vector.shape_cast %29 : vector<20x8xf32> to vector<2x10x8xf32>
    %c2 = arith.constant 2 : index
    %c0_31 = arith.constant 0 : index
    %c0_32 = arith.constant 0 : index
    %34 = vector.load %arg3[%c2, %c0_31, %c0_32] : memref<4x32x8xf32, #tpu.memory_space<vmem>>, vector<1x32x8xf32>
    %35 = vector.shape_cast %34 : vector<1x32x8xf32> to vector<32x8xf32>
    %cst_33 = arith.constant dense<0.000000e+00> : vector<16x8xf32>
    %36 = tpu.matmul %1, %35, %cst_33 {dimension_numbers = #tpu.dot_dimension_numbers<[1], [0], [0], [1], [0, 0, 1, 1], [], []>} : vector<16x32xf32>, vector<32x8xf32>, vector<16x8xf32> -> vector<16x8xf32>
    %cst_34 = arith.constant 0.353553385 : f32
    %37 = vector.broadcast %cst_34 : f32 to vector<16x8xf32>
    %38 = arith.mulf %36, %37 : vector<16x8xf32>
    %c2_35 = arith.constant 2 : index
    %c0_36 = arith.constant 0 : index
    %c0_37 = arith.constant 0 : index
    %39 = vector.load %arg4[%c2_35, %c0_36, %c0_37] : memref<4x32x8xf32, #tpu.memory_space<vmem>>, vector<1x32x8xf32>
    %40 = vector.shape_cast %39 : vector<1x32x8xf32> to vector<32x8xf32>
    %cst_38 = arith.constant dense<0.000000e+00> : vector<20x8xf32>
    %41 = tpu.matmul %3, %40, %cst_38 {dimension_numbers = #tpu.dot_dimension_numbers<[1], [0], [0], [1], [0, 0, 1, 1], [], []>} : vector<20x32xf32>, vector<32x8xf32>, vector<20x8xf32> -> vector<20x8xf32>
    %c2_39 = arith.constant 2 : index
    %c0_40 = arith.constant 0 : index
    %c0_41 = arith.constant 0 : index
    %42 = vector.load %arg5[%c2_39, %c0_40, %c0_41] : memref<4x32x8xf32, #tpu.memory_space<vmem>>, vector<1x32x8xf32>
    %43 = vector.shape_cast %42 : vector<1x32x8xf32> to vector<32x8xf32>
    %cst_42 = arith.constant dense<0.000000e+00> : vector<20x8xf32>
    %44 = tpu.matmul %3, %43, %cst_42 {dimension_numbers = #tpu.dot_dimension_numbers<[1], [0], [0], [1], [0, 0, 1, 1], [], []>} : vector<20x32xf32>, vector<32x8xf32>, vector<20x8xf32> -> vector<20x8xf32>
    %45 = vector.shape_cast %38 : vector<16x8xf32> to vector<2x8x8xf32>
    %46 = vector.shape_cast %41 : vector<20x8xf32> to vector<2x10x8xf32>
    "tpu.trace_start"() <{level = 10 : i32, message = "bqd,bkd->bqk"}> : () -> ()
    %cst_43 = arith.constant dense<0.000000e+00> : vector<2x8x10xf32>
    %47 = tpu.matmul %45, %46, %cst_43 {dimension_numbers = #tpu.dot_dimension_numbers<[2], [2], [1], [1], [0, 0, 0, 1, 1, 1], [0], [0]>} : vector<2x8x8xf32>, vector<2x10x8xf32>, vector<2x8x10xf32> -> vector<2x8x10xf32>
    "tpu.trace_stop"() : () -> ()
    %48 = vector.shape_cast %44 : vector<20x8xf32> to vector<2x10x8xf32>
    %c3 = arith.constant 3 : index
    %c0_44 = arith.constant 0 : index
    %c0_45 = arith.constant 0 : index
    %49 = vector.load %arg3[%c3, %c0_44, %c0_45] : memref<4x32x8xf32, #tpu.memory_space<vmem>>, vector<1x32x8xf32>
    %50 = vector.shape_cast %49 : vector<1x32x8xf32> to vector<32x8xf32>
    %cst_46 = arith.constant dense<0.000000e+00> : vector<16x8xf32>
    %51 = tpu.matmul %1, %50, %cst_46 {dimension_numbers = #tpu.dot_dimension_numbers<[1], [0], [0], [1], [0, 0, 1, 1], [], []>} : vector<16x32xf32>, vector<32x8xf32>, vector<16x8xf32> -> vector<16x8xf32>
    %cst_47 = arith.constant 0.353553385 : f32
    %52 = vector.broadcast %cst_47 : f32 to vector<16x8xf32>
    %53 = arith.mulf %51, %52 : vector<16x8xf32>
    %c3_48 = arith.constant 3 : index
    %c0_49 = arith.constant 0 : index
    %c0_50 = arith.constant 0 : index
    %54 = vector.load %arg4[%c3_48, %c0_49, %c0_50] : memref<4x32x8xf32, #tpu.memory_space<vmem>>, vector<1x32x8xf32>
    %55 = vector.shape_cast %54 : vector<1x32x8xf32> to vector<32x8xf32>
    %cst_51 = arith.constant dense<0.000000e+00> : vector<20x8xf32>
    %56 = tpu.matmul %3, %55, %cst_51 {dimension_numbers = #tpu.dot_dimension_numbers<[1], [0], [0], [1], [0, 0, 1, 1], [], []>} : vector<20x32xf32>, vector<32x8xf32>, vector<20x8xf32> -> vector<20x8xf32>
    %c3_52 = arith.constant 3 : index
    %c0_53 = arith.constant 0 : index
    %c0_54 = arith.constant 0 : index
    %57 = vector.load %arg5[%c3_52, %c0_53, %c0_54] : memref<4x32x8xf32, #tpu.memory_space<vmem>>, vector<1x32x8xf32>
    %58 = vector.shape_cast %57 : vector<1x32x8xf32> to vector<32x8xf32>
    %cst_55 = arith.constant dense<0.000000e+00> : vector<20x8xf32>
    %59 = tpu.matmul %3, %58, %cst_55 {dimension_numbers = #tpu.dot_dimension_numbers<[1], [0], [0], [1], [0, 0, 1, 1], [], []>} : vector<20x32xf32>, vector<32x8xf32>, vector<20x8xf32> -> vector<20x8xf32>
    %60 = vector.shape_cast %53 : vector<16x8xf32> to vector<2x8x8xf32>
    %61 = vector.shape_cast %56 : vector<20x8xf32> to vector<2x10x8xf32>
    "tpu.trace_start"() <{level = 10 : i32, message = "bqd,bkd->bqk"}> : () -> ()
    %cst_56 = arith.constant dense<0.000000e+00> : vector<2x8x10xf32>
    %62 = tpu.matmul %60, %61, %cst_56 {dimension_numbers = #tpu.dot_dimension_numbers<[2], [2], [1], [1], [0, 0, 0, 1, 1, 1], [0], [0]>} : vector<2x8x8xf32>, vector<2x10x8xf32>, vector<2x8x10xf32> -> vector<2x8x10xf32>
    "tpu.trace_stop"() : () -> ()
    %63 = vector.shape_cast %59 : vector<20x8xf32> to vector<2x10x8xf32>
    %64 = tpu.concatenate %17, %32, %47, %62 in 0 : vector<2x8x10xf32>, vector<2x8x10xf32>, vector<2x8x10xf32>, vector<2x8x10xf32> -> vector<8x8x10xf32>
    %cst_57 = arith.constant dense<0xFF800000> : vector<8x8xf32>
    %65 = vector.multi_reduction <maximumf>, %64, %cst_57 [2] : vector<8x8x10xf32> to vector<8x8xf32>
    %66 = vector.shape_cast %65 : vector<8x8xf32> to vector<8x8x1xf32>
    %67 = vector.broadcast %66 : vector<8x8x1xf32> to vector<8x8x10xf32>
    %68 = arith.subf %64, %67 : vector<8x8x10xf32>
    %69 = math.exp %68 : vector<8x8x10xf32>
    %cst_58 = arith.constant dense<0.000000e+00> : vector<8x8xf32>
    %70 = vector.multi_reduction <add>, %69, %cst_58 [2] : vector<8x8x10xf32> to vector<8x8xf32>
    %71 = vector.shape_cast %70 : vector<8x8xf32> to vector<8x8x1xf32>
    %72 = tpu.reciprocal %71 {approx = true} : vector<8x8x1xf32> -> vector<8x8x1xf32>
    %73 = arith.mulf %71, %72 : vector<8x8x1xf32>
    %cst_59 = arith.constant 2.000000e+00 : f32
    %74 = vector.broadcast %cst_59 : f32 to vector<8x8x1xf32>
    %75 = arith.subf %74, %73 : vector<8x8x1xf32>
    %76 = arith.mulf %72, %75 : vector<8x8x1xf32>
    %77 = vector.broadcast %76 : vector<8x8x1xf32> to vector<8x8x10xf32>
    %78 = arith.mulf %69, %77 : vector<8x8x10xf32>
    %cst_60 = arith.constant 0.000000e+00 : f32
    %79 = vector.broadcast %cst_60 : f32 to vector<16x32xf32>
    %80 = vector.extract_strided_slice %78 {offsets = [0, 0, 0], sizes = [2, 8, 10], strides = [1, 1, 1]} : vector<8x8x10xf32> to vector<2x8x10xf32>
    "tpu.trace_start"() <{level = 10 : i32, message = "bqk,bkv->bqv"}> : () -> ()
    %cst_61 = arith.constant dense<0.000000e+00> : vector<2x8x8xf32>
    %81 = tpu.matmul %80, %18, %cst_61 {dimension_numbers = #tpu.dot_dimension_numbers<[2], [1], [1], [2], [0, 0, 0, 1, 1, 2], [0], [0]>} : vector<2x8x10xf32>, vector<2x10x8xf32>, vector<2x8x8xf32> -> vector<2x8x8xf32>
    "tpu.trace_stop"() : () -> ()
    %82 = vector.shape_cast %81 : vector<2x8x8xf32> to vector<16x8xf32>
    %c0_62 = arith.constant 0 : index
    %c0_63 = arith.constant 0 : index
    %c0_64 = arith.constant 0 : index
    %83 = vector.load %arg6[%c0_62, %c0_63, %c0_64] : memref<4x8x32xf32, #tpu.memory_space<vmem>>, vector<1x8x32xf32>
    %84 = vector.shape_cast %83 : vector<1x8x32xf32> to vector<8x32xf32>
    %cst_65 = arith.constant dense<0.000000e+00> : vector<16x32xf32>
    %85 = tpu.matmul %82, %84, %cst_65 {dimension_numbers = #tpu.dot_dimension_numbers<[1], [0], [0], [1], [0, 0, 1, 1], [], []>} : vector<16x8xf32>, vector<8x32xf32>, vector<16x32xf32> -> vector<16x32xf32>
    %86 = arith.addf %79, %85 : vector<16x32xf32>
    %87 = vector.extract_strided_slice %78 {offsets = [2, 0, 0], sizes = [2, 8, 10], strides = [1, 1, 1]} : vector<8x8x10xf32> to vector<2x8x10xf32>
    "tpu.trace_start"() <{level = 10 : i32, message = "bqk,bkv->bqv"}> : () -> ()
    %cst_66 = arith.constant dense<0.000000e+00> : vector<2x8x8xf32>
    %88 = tpu.matmul %87, %33, %cst_66 {dimension_numbers = #tpu.dot_dimension_numbers<[2], [1], [1], [2], [0, 0, 0, 1, 1, 2], [0], [0]>} : vector<2x8x10xf32>, vector<2x10x8xf32>, vector<2x8x8xf32> -> vector<2x8x8xf32>
    "tpu.trace_stop"() : () -> ()
    %89 = vector.shape_cast %88 : vector<2x8x8xf32> to vector<16x8xf32>
    %c1_67 = arith.constant 1 : index
    %c0_68 = arith.constant 0 : index
    %c0_69 = arith.constant 0 : index
    %90 = vector.load %arg6[%c1_67, %c0_68, %c0_69] : memref<4x8x32xf32, #tpu.memory_space<vmem>>, vector<1x8x32xf32>
    %91 = vector.shape_cast %90 : vector<1x8x32xf32> to vector<8x32xf32>
    %cst_70 = arith.constant dense<0.000000e+00> : vector<16x32xf32>
    %92 = tpu.matmul %89, %91, %cst_70 {dimension_numbers = #tpu.dot_dimension_numbers<[1], [0], [0], [1], [0, 0, 1, 1], [], []>} : vector<16x8xf32>, vector<8x32xf32>, vector<16x32xf32> -> vector<16x32xf32>
    %93 = arith.addf %86, %92 : vector<16x32xf32>
    %94 = vector.extract_strided_slice %78 {offsets = [4, 0, 0], sizes = [2, 8, 10], strides = [1, 1, 1]} : vector<8x8x10xf32> to vector<2x8x10xf32>
    "tpu.trace_start"() <{level = 10 : i32, message = "bqk,bkv->bqv"}> : () -> ()
    %cst_71 = arith.constant dense<0.000000e+00> : vector<2x8x8xf32>
    %95 = tpu.matmul %94, %48, %cst_71 {dimension_numbers = #tpu.dot_dimension_numbers<[2], [1], [1], [2], [0, 0, 0, 1, 1, 2], [0], [0]>} : vector<2x8x10xf32>, vector<2x10x8xf32>, vector<2x8x8xf32> -> vector<2x8x8xf32>
    "tpu.trace_stop"() : () -> ()
    %96 = vector.shape_cast %95 : vector<2x8x8xf32> to vector<16x8xf32>
    %c2_72 = arith.constant 2 : index
    %c0_73 = arith.constant 0 : index
    %c0_74 = arith.constant 0 : index
    %97 = vector.load %arg6[%c2_72, %c0_73, %c0_74] : memref<4x8x32xf32, #tpu.memory_space<vmem>>, vector<1x8x32xf32>
    %98 = vector.shape_cast %97 : vector<1x8x32xf32> to vector<8x32xf32>
    %cst_75 = arith.constant dense<0.000000e+00> : vector<16x32xf32>
    %99 = tpu.matmul %96, %98, %cst_75 {dimension_numbers = #tpu.dot_dimension_numbers<[1], [0], [0], [1], [0, 0, 1, 1], [], []>} : vector<16x8xf32>, vector<8x32xf32>, vector<16x32xf32> -> vector<16x32xf32>
    %100 = arith.addf %93, %99 : vector<16x32xf32>
    %101 = vector.extract_strided_slice %78 {offsets = [6, 0, 0], sizes = [2, 8, 10], strides = [1, 1, 1]} : vector<8x8x10xf32> to vector<2x8x10xf32>
    "tpu.trace_start"() <{level = 10 : i32, message = "bqk,bkv->bqv"}> : () -> ()
    %cst_76 = arith.constant dense<0.000000e+00> : vector<2x8x8xf32>
    %102 = tpu.matmul %101, %63, %cst_76 {dimension_numbers = #tpu.dot_dimension_numbers<[2], [1], [1], [2], [0, 0, 0, 1, 1, 2], [0], [0]>} : vector<2x8x10xf32>, vector<2x10x8xf32>, vector<2x8x8xf32> -> vector<2x8x8xf32>
    "tpu.trace_stop"() : () -> ()
    %103 = vector.shape_cast %102 : vector<2x8x8xf32> to vector<16x8xf32>
    %c3_77 = arith.constant 3 : index
    %c0_78 = arith.constant 0 : index
    %c0_79 = arith.constant 0 : index
    %104 = vector.load %arg6[%c3_77, %c0_78, %c0_79] : memref<4x8x32xf32, #tpu.memory_space<vmem>>, vector<1x8x32xf32>
    %105 = vector.shape_cast %104 : vector<1x8x32xf32> to vector<8x32xf32>
    %cst_80 = arith.constant dense<0.000000e+00> : vector<16x32xf32>
    %106 = tpu.matmul %103, %105, %cst_80 {dimension_numbers = #tpu.dot_dimension_numbers<[1], [0], [0], [1], [0, 0, 1, 1], [], []>} : vector<16x8xf32>, vector<8x32xf32>, vector<16x32xf32> -> vector<16x32xf32>
    %107 = arith.addf %100, %106 : vector<16x32xf32>
    %108 = vector.shape_cast %107 : vector<16x32xf32> to vector<2x8x32xf32>
    %c0_81 = arith.constant 0 : index
    %c0_82 = arith.constant 0 : index
    %c0_83 = arith.constant 0 : index
    %109 = vector.load %arg7[%c0_81, %c0_82, %c0_83] : memref<2x8x32xf32, #tpu.memory_space<vmem>>, vector<2x8x32xf32>
    tpu.vector_store %arg7[%c0_81, %c0_82, %c0_83], %108 {strides = array<i32>} : memref<2x8x32xf32, #tpu.memory_space<vmem>>, vector<2x8x32xf32>,
    return
  }
  func.func @transform_0(%arg0: i32) -> (i32, i32, i32) {
    %c0_i32 = arith.constant 0 : i32
    %c0_i32_0 = arith.constant 0 : i32
    %c0_i32_1 = arith.constant 0 : i32
    return %arg0, %c0_i32, %c0_i32_0 : i32, i32, i32
  }
  func.func @transform_1(%arg0: i32) -> (i32, i32, i32) {
    %c0_i32 = arith.constant 0 : i32
    %c0_i32_0 = arith.constant 0 : i32
    %c0_i32_1 = arith.constant 0 : i32
    return %arg0, %c0_i32, %c0_i32_0 : i32, i32, i32
  }
  func.func @transform_2(%arg0: i32) -> (i32, i32, i32) {
    %c0_i32 = arith.constant 0 : i32
    %c0_i32_0 = arith.constant 0 : i32
    %c0_i32_1 = arith.constant 0 : i32
    %c0_i32_2 = arith.constant 0 : i32
    return %c0_i32, %c0_i32_0, %c0_i32_1 : i32, i32, i32
  }
  func.func @transform_3(%arg0: i32) -> (i32, i32, i32) {
    %c0_i32 = arith.constant 0 : i32
    %c0_i32_0 = arith.constant 0 : i32
    %c0_i32_1 = arith.constant 0 : i32
    %c0_i32_2 = arith.constant 0 : i32
    return %c0_i32, %c0_i32_0, %c0_i32_1 : i32, i32, i32
  }
  func.func @transform_4(%arg0: i32) -> (i32, i32, i32) {
    %c0_i32 = arith.constant 0 : i32
    %c0_i32_0 = arith.constant 0 : i32
    %c0_i32_1 = arith.constant 0 : i32
    %c0_i32_2 = arith.constant 0 : i32
    return %c0_i32, %c0_i32_0, %c0_i32_1 : i32, i32, i32
  }
  func.func @transform_5(%arg0: i32) -> (i32, i32, i32) {
    %c0_i32 = arith.constant 0 : i32
    %c0_i32_0 = arith.constant 0 : i32
    %c0_i32_1 = arith.constant 0 : i32
    %c0_i32_2 = arith.constant 0 : i32
    return %c0_i32, %c0_i32_0, %c0_i32_1 : i32, i32, i32
  }
  func.func @transform_6(%arg0: i32) -> (i32, i32, i32) {
    %c0_i32 = arith.constant 0 : i32
    %c0_i32_0 = arith.constant 0 : i32
    %c0_i32_1 = arith.constant 0 : i32
    return %arg0, %c0_i32, %c0_i32_0 : i32, i32, i32
  }
}

</mosaic_0001>

<bundles_post_ra>
// kernel: tpu_custom_call.1
= control target key start
LH: loop header
LB: loop body
LE: loop exit
PB: predicated region body
PF: predicated region fallthrough
CT: control target
= control target key end

     0   :  { %11 = vsyncpa [#allocation3], 0  ;;  %s5452_s0 = inlined_call_operand.vmem [shape: f32[4,8,32], index: 0, kind: input, shape index: {}]   ;;  %s5453_s1 = inlined_call_operand.vmem [shape: f32[4,10,32], index: 1, kind: input, shape index: {}]   ;;  %s5454_s2 = inlined_call_operand.vmem [shape: f32[4,32,8], index: 2, kind: input, shape index: {}]   ;;  %s5455_s3 = inlined_call_operand.vmem [shape: f32[4,32,8], index: 3, kind: input, shape index: {}]   ;;  %s5456_s4 = inlined_call_operand.vmem [shape: f32[4,32,8], index: 4, kind: input, shape index: {}]   ;;  %s5457_s5 = inlined_call_operand.vmem [shape: f32[4,8,32], index: 5, kind: input, shape index: {}]   ;;  %s5458_s6 = inlined_call_operand.hbm [shape: f32[4,8,32], index: 6, kind: output, shape index: {}]  }
   0x1   :  { %13 = vsyncpa [#allocation3 + $0x1], 0  ;;  %s4675_s21 = smov 0   ;;  %s4677_s22 = smov 0  }
   0x2   :  { %s4679_s23 = smov 0   ;;  %s4681_s24 = smov 0  }
   0x3 LB: > { %s4696_s25 = sadd.s32 4294967295, %s4632_s24   ;;  %s3904_s26 = sadd.s32 4294967294, %s4632_s24   ;;  %s4632_s24 = sphi %s4681_s24, %s5464_s24   ;;  %s4628_s23 = sphi %s4679_s23, %s5463_s23   ;;  %s4624_s22 = sphi %s4677_s22, %s5462_s22   ;;  %s4620_s21 = sphi %s4675_s21, %s5461_s21  }
   0x4   : > { %s4700_s27 = sadd.s32 1, %s4632_s24   ;;  %s162_s28 = sadd.s32 1, %s4628_s23 }
   0x5   : > { %s159_s29 = ssub.s32 %s4632_s24, %s4700_s27  ;;  %p172_p0 = scmp.ne.s32.totalorder %s4628_s23, %s4624_s22 }
   0x6   : > { %p160_p1 = scmp.eq.s32.totalorder %s159_s29, 0  ;;  %p173_p2 = scmp.eq.s32.totalorder %s4696_s25, 1 }
   0x7   : > { %p178_p3 = scmp.ne.s32.totalorder %s4624_s22, %s4620_s21  ;;  %p179_p4 = scmp.eq.s32.totalorder %s3904_s26, 1 }
   0x8   : > { %s4711_s30 = scalar_select %p160_p1, %s4628_s23, %s162_s28  }
   0x9   : > { %p4713_p5 = por %p173_p2, %p172_p0  ;;  %p4717_p6 = por %p179_p4, %p178_p3 }
   0xa   : > { %p3907_p7 = scmp.ge.s32.totalorder %s4632_s24, 1  ;;  %p228_p8 = scmp.lt.s32.totalorder %s4632_s24, 3 }
   0xc   : > { %p229_p9 = pnand %p3907_p7, %p228_p8 }
   0xd   : > { %s3909_s11 = sshll.u32 (!%p229_p9), %s4696_s25, 1  ;;  %s261_s18 = sand.u32 (!%p229_p9), 1, %s4624_s22  }
   0xe   : > { %232 = sbr.rel (%p229_p9) target bundleno = 1831 (0x727), region = 44  ;;  %p265_p10 = scmp.lt.s32.totalorder (!%p229_p9), %s3909_s11, 3 }
   0xf   : > { %s4041_s26 = sshll.u32 (!%p229_p9), %s4696_s25, 8  ;;  %s4637_s12 = smov (!%p229_p9), [#allocation2]  }
  0x10   : > { %s4576_s13 = sshll.u32 (!%p229_p9), %s4637_s12, 4  ;;  %s4577_s13 = int_to_ptr.vmem [resolvable:$false] %s4576_s13 }
  0x13   : > { %v427_v0 = vld [vmem:[%s5455_s3 + $0x18] sm:$0xff]  ;;  %v292_v1 = vlaneseq  ;;  %v4634_v2 = vmov 0.0   ;;  %v426_v3 = vld [vmem:[%s5455_s3 + $0x10] sm:$0xff]  ;;  %vm4635_vm0 = vmmov 0   ;;  %v4636_v5 = vmov 1983009808  }
  0x14   : > { %4193 = vmatprep.subr.mxu1 %v4634_v2  ;;  %4201 = vmatprep.mubr.msk.f32.mxu1 %vm4635_vm0, %v4634_v2  ;;  %v339_v4 = vld [vmem:[%s5454_s2 + $0x18] sm:$0xff]  ;;  %v290_v6 = vunpack.c.l.s4 %v4636_v5  ;;  %v338_v8 = vld [vmem:[%s5454_s2 + $0x10] sm:$0xff]  ;;  %v425_v9 = vld [vmem:[%s5455_s3 + $0x8] sm:$0xff]  ;;  %s5466_s11 = smov (!%p265_p10, %s3909_s11), 3  ;;  %vm340_vm1 = vcmask 261120   ;;  %vm709_vm2 = vcmask 64512  }
  0x15   : > { %4194 = vmatpush3.msra.mxu1 %v427_v0  ;;  %v293_v7 = vshrl.u32 %v292_v1, 7  ;;  %4182 = vmatprep.subr.mxu0 %v339_v4  ;;  %v337_v10 = vld [vmem:[%s5454_s2 + $0x8] sm:$0xff]  ;;  %v424_v12 = vld [vmem:[%s5455_s3] sm:$0xff]  ;;  %s4040_s9 = sshll.u32 %s5466_s11, 4  ;;  %s3910_s10 = sshll.u32 %s5466_s11, 3  ;;  %v559_v43 = vld [vmem:[%s5456_s4 + $0x18] sm:$0xff] }
  0x16   : > { %4195 = vmatprep.subr.mxu1 %v4634_v2  ;;  %4183 = vmatpush3.msra.mxu0 %v339_v4  ;;  %v291_v11 = vunpack.c.0.s8 %v290_v6  ;;  %s4753_s14 = scalar_lea.vmem %s5453_s1, %s4040_s9  ;;  %v336_v14 = vld [vmem:[%s5454_s2] sm:$0xff]  ;;  %s268_s11 = scalar_lea.vmem %s5452_s0, %s3910_s10  ;;  %v558_v44 = vld [vmem:[%s5456_s4 + $0x10] sm:$0xff]  ;;  %v557_v45 = vld [vmem:[%s5456_s4 + $0x8] sm:$0xff]  ;;  %vm2565_vm3 = vcmask 80896   ;;  %vm2706_vm4 = vcmask 1041408  }
  0x17   : > { %4196 = vmatpush3.msra.mxu1 %v426_v3  ;;  %4184 = vmatprep.subr.mxu0 %v338_v8  ;;  %v280_v15 = vld [vmem:[%s4753_s14] sm:$0xff]  ;;  %v282_v16 = vld [vmem:[%s4753_s14 + $0x10] sm:$0xff]  ;;  %v4770_v22 = vld [vmem:[%s268_s11 + $0x8] sm:$0xff]  ;;  %s5409_s9 = scalar_lea.hbm %s5458_s6, %s4041_s26  ;;  %s5412_s10 = scalar_lea.sflag [#allocation3], %s261_s18 }
  0x18   : > { %4197 = vmatprep.subr.mxu1 %v4634_v2  ;;  %4185 = vmatpush3.msra.mxu0 %v338_v8  ;;  %v4755_v13 = vsub.s32 %v291_v11, %v293_v7  ;;  %v288_v17 = vcombine.high %v280_v15, %v280_v15  ;;  %v312_v19 = vcombine.high %v282_v16, %v282_v16  ;;  %v4768_v21 = vld [vmem:[%s268_s11] sm:$0xff]  ;;  %v3914_v23 = vld.sshfl [vmem:[%s4753_s14 + $0x8] sm:$0x3 pattern:$0x76325410]  ;;  %s3908_s11 = sshll.u32 %s261_s18, 4 }
  0x19   : > { %4198 = vmatpush3.msra.mxu1 %v425_v9  ;;  %4186 = vmatprep.subr.mxu0 %v337_v10  ;;  %v3915_v38 = vld.sshfl [vmem:[%s4753_s14 + $0x18] sm:$0x3 pattern:$0x76325410]  ;;  %v556_v46 = vld [vmem:[%s5456_s4] sm:$0xff]  ;;  %s263_s19 = scalar_lea.vmem [#allocation2], %s3908_s11 }
  0x1a   : > { %4199 = vmatprep.subr.mxu1 %v4634_v2  ;;  %4187 = vmatpush3.msra.mxu0 %v337_v10  ;;  %v295_v18 = vrot.slane %v280_v15, %v4755_v13  ;;  %v319_v20 = vrot.slane %v282_v16, %v4755_v13  ;;  %v302_v24 = vrot.slane %v288_v17, %v4755_v13  ;;  %s3830_s20 = sshll.u32 %s263_s19, 4  ;;  %s4578_s14 = scalar_lea.vmem %s4577_s13, 512  ;;  %s5403_s20 = int_to_ptr.vmem [resolvable:$true] %s3830_s20 }
  0x1b   : > { %4200 = vmatpush3.msra.mxu1 %v424_v12  ;;  %4188 = vmatprep.subr.mxu0 %v336_v14  ;;  %v326_v26 = vrot.slane %v312_v19, %v4755_v13  ;;  %v3933_v12 = vld [vmem:[%s5454_s2 + $0x38] sm:$0xff]  ;;  %s4572_s25 = scalar_lea.vmem %s5403_s20, 256  ;;  %p4579_p0 = scmp.lt.s32.totalorder %s5403_s20, %s4577_s13 }
  0x1c   : > { %4190 = vmatprep.mubr.msk.f32.mxu0 %vm340_vm1, %v4768_v21  ;;  %v303_v25 = vcombine.high %v295_v18, %v295_v18  ;;  %v327_v27 = vcombine.high %v319_v20, %v319_v20  ;;  %4189 = vmatpush3.msra.mxu0 %v336_v14  ;;  %v304_v28 = vcombine.high %v302_v24, %v302_v24  ;;  %p4573_p11 = scmp.ne.s32.totalorder %s5403_s20, %s4572_s25  ;;  %p4580_p1 = scmp.lt.s32.totalorder %s4578_s14, %s4572_s25 }
  0x1d   : > { %4191 = vmatmul.mubr.msk.f32.vlgmr.msra.gmra.mxu0 %vm340_vm1, %v4770_v22  ;;  %4210 = vmatprep.subr.mxu0 %v4634_v2  ;;  %v445_v30 = vcombine.low %v3914_v23, %v319_v20  ;;  %v328_v37 = vcombine.high %v326_v26, %v326_v26  ;;  %v3931_v23 = vld [vmem:[%s5454_s2 + $0x28] sm:$0xff] }
  0x1e   : > { %v428_v29 = vcombine.low %v295_v18, %v303_v25  ;;  %v446_v31 = vcombine.low %v327_v27, %v326_v26  ;;  %4218 = vmatprep.mubr.msk.f32.mxu0 %vm4635_vm0, %v4634_v2  ;;  %4227 = vmatprep.subr.mxu1 %v4634_v2  ;;  %v429_v32 = vcombine.low %v302_v24, %v304_v28  ;;  %v3932_v18 = vld [vmem:[%s5454_s2 + $0x30] sm:$0xff]  ;;  %v3939_v24 = vld [vmem:[%s5455_s3 + $0x38] sm:$0xff]  ;;  %v3930_v25 = vld [vmem:[%s5454_s2 + $0x20] sm:$0xff]  ;;  %p4574_p12 = pnand %p4573_p11, %p4713_p5  ;;  %p4581_p2 = por %p4580_p1, %p4579_p0 }
  0x1f   : > { %v453_v35 = vrot.slane %v445_v30, %v4755_v13  ;;  %v462_v41 = vcombine.low %v328_v37, %v3915_v38  ;;  %4211 = vmatpush3.msra.mxu0 %v559_v43  ;;  %v3938_v26 = vld [vmem:[%s5455_s3 + $0x30] sm:$0xff]  ;;  %v3937_v27 = vld [vmem:[%s5455_s3 + $0x28] sm:$0xff]  ;;  %v3936_v28 = vld [vmem:[%s5455_s3 + $0x20] sm:$0xff] }
  0x20   : > { %v436_v33 = vrot.slane %v428_v29, %v4755_v13  ;;  %v443_v34 = vrot.slane %v429_v32, %v4755_v13  ;;  %v460_v36 = vrot.slane %v446_v31, %v4755_v13  ;;  %4212 = vmatprep.subr.mxu0 %v4634_v2  ;;  %p4575_p13 = pneg %p4574_p12 }
  0x21   : > { %v4799_v42 = vrot.slane %v462_v41, %v4755_v13  ;;  %4213 = vmatpush3.msra.mxu0 %v558_v44 }
  0x22   : > { %v4788_v39 = vcombine.low %v436_v33, %v443_v34  ;;  %v4792_v40 = vcombine.low %v453_v35, %v460_v36  ;;  %4214 = vmatprep.subr.mxu0 %v4634_v2  ;;  %p4582_p3 = pnand %p4581_p2, %p4575_p13 }
  0x23   : > { %4215 = vmatpush3.msra.mxu0 %v557_v45 }
  0x24   : > { %4202 = vmatmul.mubr.msk.f32.vlgmr.msra.gmra.mxu1 %vm340_vm1, %v4788_v39  ;;  %4216 = vmatprep.subr.mxu0 %v4634_v2 }
  0x25   : > { %4204 = vmatprep.mubr.msk.f32.mxu1 %vm4635_vm0, %v4634_v2  ;;  %4217 = vmatpush3.msra.mxu0 %v556_v46 }
  0x26   : > { %4219 = vmatmul.mubr.msk.f32.vlgmr.msra.gmra.mxu0 %vm340_vm1, %v4788_v39  ;;  %4234 = vmatprep.subr.mxu0 %v4634_v2 }
  0x27   : > { %4221 = vmatprep.mubr.msk.f32.mxu0 %vm4635_vm0, %v4634_v2 }
  0x28   : > { %4205 = vmatmul.mubr.msk.f32.gmra.mxu1 %vm340_vm1, %v4792_v40 }
  0x29   : > { %4207 = vmatprep.mubr.msk.f32.mxu1 %vm4635_vm0, %v4634_v2 }
  0x2a   : > { %4222 = vmatmul.mubr.msk.f32.gmra.mxu0 %vm340_vm1, %v4792_v40 }
  0x2b   : > { %4224 = vmatprep.mubr.msk.f32.mxu0 %vm4635_vm0, %v4634_v2 }
  0x2c   : > { %4208 = vmatmul.mubr.msk.f32.gmra.mxu1 %vm340_vm1, %v4799_v42 }
  0x2d   : > { %4231 = vmatprep.mubr.msk.f32.mxu1 %vm4635_vm0, %v4634_v2 }
  0x2e   : > { %4225 = vmatmul.mubr.msk.f32.gmra.mxu0 %vm340_vm1, %v4799_v42 }
  0x2f   : > { %4238 = vmatprep.mubr.msk.f32.mxu0 %vm4635_vm0, %v4634_v2 }
  0xdd   : > { %v4192_v59 = vpop.f32.mrf.mxu0 }
  0xde   : > { %v423_v20 = vmul.f32 0.35355338, %v4192_v59 }
  0xdf   : > { %v413_v7 = vpop.f32.mrf.mxu0 }
  0xe0   : > { %v422_v16 = vmul.f32 0.35355338, %v413_v7 }
  0xe4   : > { %v542_v47 = vpop.f32.mrf.mxu1 }
  0xe5   : > { %v643_v48 = vcombine.high %v542_v47, %v542_v47  ;;  %v650_v49 = vrot.slane %v542_v47, %v4755_v13 }
  0xe6   : > { %v4203_v50 = vpop.f32.mrf.mxu1  ;;  %v4904_v29 = vpop.f32.mrf.mxu0 }
  0xe7   : > { %v657_v51 = vrot.slane %v643_v48, %v4755_v13  ;;  %v658_v52 = vcombine.high %v650_v49, %v650_v49  ;;  %v3945_v50 = vld [vmem:[%s5456_s4 + $0x30] sm:$0xff] }
  0xe8   : > { %v547_v53 = vpop.f32.mrf.mxu1  ;;  %v4220_v30 = vpop.f32.mrf.mxu0 }
  0xe9   : > { %v659_v54 = vcombine.high %v657_v51, %v657_v51  ;;  %v685_v55 = vcombine.low %v650_v49, %v658_v52  ;;  %v660_v56 = vcombine.high %v547_v53, %v547_v53  ;;  %v667_v57 = vrot.slane %v547_v53, %v4755_v13  ;;  %v3946_v49 = vld [vmem:[%s5456_s4 + $0x38] sm:$0xff]  ;;  %v3943_v52 = vld [vmem:[%s5456_s4 + $0x20] sm:$0xff] }
  0xea   : > { %v4206_v58 = vpop.f32.mrf.mxu1  ;;  %v631_v31 = vpop.f32.mrf.mxu0 }
  0xeb   : > { %v686_v60 = vcombine.low %v657_v51, %v659_v54  ;;  %v674_v61 = vrot.slane %v660_v56, %v4755_v13  ;;  %v675_v62 = vcombine.high %v667_v57, %v667_v57  ;;  %v708_v63 = vrot.slane %v667_v57, %v4755_v13  ;;  %v3944_v51 = vld [vmem:[%s5456_s4 + $0x28] sm:$0xff] }
  0xec   : > { %v552_v0 = vpop.f32.mrf.mxu1  ;;  %v693_v1 = vrot.slane %v685_v55, %v4755_v13  ;;  %v908_v32 = vcombine.high %v631_v31, %v631_v31  ;;  %v4907_v33 = vrot.slane %v631_v31, %v4755_v13  ;;  %v4223_v34 = vpop.f32.mrf.mxu0 }
  0xed   : > { %v700_v3 = vrot.slane %v686_v60, %v4755_v13  ;;  %v676_v4 = vcombine.high %v674_v61, %v674_v61  ;;  %v683_v5 = vrot.slane %v552_v0, %v4755_v13  ;;  %4228 = vmatpush3.xpose.msk.msra.mxu1 %vm709_vm2, %v708_v63  ;;  %v787_v9 = vcombine.low %v675_v62, %v674_v61  ;;  %v3958_v34 = vld [vmem:[%s5454_s2 + $0x50] sm:$0xff] }
  0xee   : > { %v4209_v6 = vpop.f32.mrf.mxu1  ;;  %4229 = vmatprep.subr.mxu1 %v4634_v2  ;;  %v922_v35 = vrot.slane %v908_v32, %v4755_v13  ;;  %v923_v36 = vcombine.high %v4907_v33, %v4907_v33  ;;  %v636_v38 = vpop.f32.mrf.mxu0 }
  0xef   : > { %v701_v8 = vcombine.low %v693_v1, %v700_v3  ;;  %v684_v10 = vcombine.high %v683_v5, %v683_v5  ;;  %v788_v11 = vcombine.low %v676_v4, %v683_v5  ;;  %v795_v17 = vrot.slane %v787_v9, %v4755_v13 }
  0xf0   : > { %v2779_v37 = vcombine.low %v923_v36, %v922_v35  ;;  %v924_v41 = vcombine.high %v922_v35, %v922_v35  ;;  %v4913_v43 = vrot.slane %v636_v38, %v4755_v13  ;;  %v4226_v44 = vpop.f32.mrf.mxu0  ;;  %v3965_v38 = vld [vmem:[%s5455_s3 + $0x58] sm:$0xff] }
  0xf1   : > { %v802_v14 = vrot.slane %v788_v11, %v4755_v13  ;;  %v810_v15 = vrot.slane %v684_v10, %v4755_v13  ;;  %4230 = vmatpush3.xpose.msk.msra.mxu1 %vm709_vm2, %v701_v8  ;;  %v3964_v44 = vld [vmem:[%s5455_s3 + $0x50] sm:$0xff] }
  0xf2   : > { %4241 = vmatprep.subr.mxu1 %v3933_v12  ;;  %v2787_v45 = vrot.slane %v2779_v37, %v4755_v13  ;;  %v2780_v46 = vcombine.low %v924_v41, %v4913_v43  ;;  %v3957_v37 = vld [vmem:[%s5454_s2 + $0x48] sm:$0xff]  ;;  %v3956_v41 = vld [vmem:[%s5454_s2 + $0x40] sm:$0xff] }
  0xf3   : > { %4235 = vmatpush3.xpose.msk.msra.mxu0 %vm709_vm2, %v810_v15  ;;  %v803_v19 = vcombine.low %v795_v17, %v802_v14 }
  0xf4   : > { %4236 = vmatprep.subr.mxu0 %v4634_v2  ;;  %4232 = vmatmul.mubr.msk.f32.vlgmr.msra.gmra.mxu1 %vm709_vm2, %v422_v16  ;;  %v2794_v47 = vrot.slane %v2780_v46, %v4755_v13  ;;  %v3962_v46 = vld [vmem:[%s5455_s3 + $0x40] sm:$0xff] }
  0xf5   : > { %4242 = vmatpush3.msra.mxu1 %v3933_v12  ;;  %4249 = vmatprep.mubr.msk.f32.mxu1 %vm340_vm1, %v4768_v21 }
  0xf6   : > { %4243 = vmatprep.subr.mxu1 %v3932_v18  ;;  %v4918_v48 = vcombine.low %v2787_v45, %v2794_v47  ;;  %v3963_v45 = vld [vmem:[%s5455_s3 + $0x48] sm:$0xff] }
  0xf7   : > { %4237 = vmatpush3.xpose.msk.msra.mxu0 %vm709_vm2, %v803_v19  ;;  %4244 = vmatpush3.msra.mxu1 %v3932_v18 }
  0xf8   : > { %4252 = vmatprep.subr.mxu0 %v4634_v2  ;;  %4245 = vmatprep.subr.mxu1 %v3931_v23 }
  0xf9   : > { %4246 = vmatpush3.msra.mxu1 %v3931_v23 }
  0xfa   : > { %4239 = vmatmul.mubr.msk.f32.vlgmr.msra.gmra.mxu0 %vm709_vm2, %v423_v20  ;;  %4247 = vmatprep.subr.mxu1 %v3930_v25 }
  0xfb   : > { %4253 = vmatpush3.msra.mxu0 %v3939_v24  ;;  %4260 = vmatprep.mubr.msk.f32.mxu0 %vm4635_vm0, %v4634_v2 }
  0xfc   : > { %4254 = vmatprep.subr.mxu0 %v4634_v2  ;;  %4248 = vmatpush3.msra.mxu1 %v3930_v25 }
  0xfd   : > { %4255 = vmatpush3.msra.mxu0 %v3938_v26  ;;  %4250 = vmatmul.mubr.msk.f32.vlgmr.msra.gmra.mxu1 %vm340_vm1, %v4770_v22 }
  0xfe   : > { %4256 = vmatprep.subr.mxu0 %v4634_v2  ;;  %4269 = vmatprep.subr.mxu1 %v4634_v2 }
  0xff   : > { %4257 = vmatpush3.msra.mxu0 %v3937_v27  ;;  %4277 = vmatprep.mubr.msk.f32.mxu1 %vm4635_vm0, %v4634_v2  ;;  %v3959_v27 = vld [vmem:[%s5454_s2 + $0x58] sm:$0xff] }
 0x100   : > { %4258 = vmatprep.subr.mxu0 %v4634_v2  ;;  %4270 = vmatpush3.msra.mxu1 %v3946_v49 }
 0x101   : > { %4259 = vmatpush3.msra.mxu0 %v3936_v28  ;;  %4271 = vmatprep.subr.mxu1 %v4634_v2 }
 0x102   : > { %4261 = vmatmul.mubr.msk.f32.vlgmr.msra.gmra.mxu0 %vm340_vm1, %v4788_v39  ;;  %4286 = vmatprep.subr.mxu0 %v4634_v2 }
 0x103   : > { %4263 = vmatprep.mubr.msk.f32.mxu0 %vm4635_vm0, %v4634_v2  ;;  %4272 = vmatpush3.msra.mxu1 %v3945_v50 }
 0x104   : > { %4273 = vmatprep.subr.mxu1 %v4634_v2 }
 0x105   : > { %4274 = vmatpush3.msra.mxu1 %v3944_v51 }
 0x106   : > { %4264 = vmatmul.mubr.msk.f32.gmra.mxu0 %vm340_vm1, %v4792_v40  ;;  %4275 = vmatprep.subr.mxu1 %v4634_v2 }
 0x107   : > { %4266 = vmatprep.mubr.msk.f32.mxu0 %vm4635_vm0, %v4634_v2  ;;  %4276 = vmatpush3.msra.mxu1 %v3943_v52 }
 0x108   : > { %4278 = vmatmul.mubr.msk.f32.vlgmr.msra.gmra.mxu1 %vm340_vm1, %v4788_v39  ;;  %4293 = vmatprep.subr.mxu1 %v4634_v2 }
 0x109   : > { %4280 = vmatprep.mubr.msk.f32.mxu1 %vm4635_vm0, %v4634_v2 }
 0x10a   : > { %4267 = vmatmul.mubr.msk.f32.gmra.mxu0 %vm340_vm1, %v4799_v42 }
 0x10b   : > { %4290 = vmatprep.mubr.msk.f32.mxu0 %vm4635_vm0, %v4634_v2 }
 0x10c   : > { %4281 = vmatmul.mubr.msk.f32.gmra.mxu1 %vm340_vm1, %v4792_v40 }
 0x10d   : > { %4283 = vmatprep.mubr.msk.f32.mxu1 %vm4635_vm0, %v4634_v2 }
 0x110   : > { %4284 = vmatmul.mubr.msk.f32.gmra.mxu1 %vm340_vm1, %v4799_v42 }
 0x111   : > { %4297 = vmatprep.mubr.msk.f32.mxu1 %vm4635_vm0, %v4634_v2 }
 0x1b4   : > { %v4948_v53 = vpop.f32.mrf.mxu1 }
 0x1b5   : > { %v2566_v54 = vsel %vm2565_vm3, %v4948_v53, -inf }
 0x1b6   : > { %2567 = vmax.xlane.f32.xlu0 %v2566_v54  ;;  %v4233_v55 = vpop.f32.mrf.mxu1 }
 0x1ba   : > { %v4952_v56 = vpop.f32.mrf.mxu0 }
 0x1bb   : > { %v2569_v57 = vsel %vm2565_vm3, %v4952_v56, -inf }
 0x1bc   : > { %v4240_v58 = vpop.f32.mrf.mxu0  ;;  %2570 = vmax.xlane.f32.xlu0 %v2569_v57 }
 0x1bd   : > { %v4251_v8 = vpop.f32.mrf.mxu1 }
 0x1be   : > { %v1014_v36 = vmul.f32 0.35355338, %v4251_v8 }
 0x1bf   : > { %v1004_v20 = vpop.f32.mrf.mxu1 }
 0x1c0   : > { %v1013_v31 = vmul.f32 0.35355338, %v1004_v20 }
 0x1c2   : > { %v1086_v59 = vpop.f32.mrf.mxu0 }
 0x1c3   : > { %v1188_v60 = vcombine.high %v1086_v59, %v1086_v59  ;;  %v1195_v61 = vrot.slane %v1086_v59, %v4755_v13 }
 0x1c4   : > { %v4262_v62 = vpop.f32.mrf.mxu0 }
 0x1c5   : > { %v1202_v63 = vrot.slane %v1188_v60, %v4755_v13  ;;  %v1203_v0 = vcombine.high %v1195_v61, %v1195_v61 }
 0x1c6   : > { %v1091_v1 = vpop.f32.mrf.mxu0 }
 0x1c7   : > { %v1204_v3 = vcombine.high %v1202_v63, %v1202_v63  ;;  %v1230_v4 = vcombine.low %v1195_v61, %v1203_v0  ;;  %v1205_v5 = vcombine.high %v1091_v1, %v1091_v1  ;;  %v1212_v6 = vrot.slane %v1091_v1, %v4755_v13 }
 0x1c8   : > { %v4265_v7 = vpop.f32.mrf.mxu0  ;;  %v5025_v47 = vpop.f32.mrf.mxu1 }
 0x1c9   : > { %v1231_v9 = vcombine.low %v1202_v63, %v1204_v3  ;;  %v1219_v10 = vrot.slane %v1205_v5, %v4755_v13  ;;  %v1220_v11 = vcombine.high %v1212_v6, %v1212_v6  ;;  %v1253_v12 = vrot.slane %v1212_v6, %v4755_v13  ;;  %v3971_v5 = vld [vmem:[%s5456_s4 + $0x50] sm:$0xff]  ;;  %v3970_v6 = vld [vmem:[%s5456_s4 + $0x48] sm:$0xff]  ;;  %v3969_v7 = vld [vmem:[%s5456_s4 + $0x40] sm:$0xff] }
 0x1ca   : > { %v1096_v14 = vpop.f32.mrf.mxu0  ;;  %v1238_v15 = vrot.slane %v1230_v4, %v4755_v13  ;;  %v4279_v49 = vpop.f32.mrf.mxu1  ;;  %v3972_v4 = vld [vmem:[%s5456_s4 + $0x58] sm:$0xff] }
 0x1cb   : > { %v1245_v16 = vrot.slane %v1231_v9, %v4755_v13  ;;  %v1221_v17 = vcombine.high %v1219_v10, %v1219_v10  ;;  %v1228_v18 = vrot.slane %v1096_v14, %v4755_v13  ;;  %4287 = vmatpush3.xpose.msk.msra.mxu0 %vm709_vm2, %v1253_v12  ;;  %v1331_v24 = vcombine.low %v1220_v11, %v1219_v10 }
 0x1cc   : > { %v4268_v19 = vpop.f32.mrf.mxu0  ;;  %4288 = vmatprep.subr.mxu0 %v4634_v2  ;;  %v1176_v50 = vpop.f32.mrf.mxu1 }
 0x1cd   : > { %v1246_v23 = vcombine.low %v1238_v15, %v1245_v16  ;;  %v1229_v25 = vcombine.high %v1228_v18, %v1228_v18  ;;  %v1332_v26 = vcombine.low %v1221_v17, %v1228_v18  ;;  %v1339_v32 = vrot.slane %v1331_v24, %v4755_v13 }
 0x1ce   : > { %v1452_v51 = vcombine.high %v1176_v50, %v1176_v50  ;;  %v5028_v52 = vrot.slane %v1176_v50, %v4755_v13  ;;  %v4282_v54 = vpop.f32.mrf.mxu1 }
 0x1cf   : > { %v1346_v28 = vrot.slane %v1332_v26, %v4755_v13  ;;  %v1354_v30 = vrot.slane %v1229_v25, %v4755_v13  ;;  %4289 = vmatpush3.xpose.msk.msra.mxu0 %vm709_vm2, %v1246_v23 }
 0x1d0   : > { %4300 = vmatprep.subr.mxu0 %v3959_v27  ;;  %v1466_v55 = vrot.slane %v1452_v51, %v4755_v13  ;;  %v1467_v57 = vcombine.high %v5028_v52, %v5028_v52  ;;  %v1181_v59 = vpop.f32.mrf.mxu1 }
 0x1d1   : > { %4294 = vmatpush3.xpose.msk.msra.mxu1 %vm709_vm2, %v1354_v30  ;;  %v1347_v35 = vcombine.low %v1339_v32, %v1346_v28  ;;  %v5034_v61 = vrot.slane %v1181_v59, %v4755_v13 }
 0x1d2   : > { %4295 = vmatprep.subr.mxu1 %v4634_v2  ;;  %4291 = vmatmul.mubr.msk.f32.vlgmr.msra.gmra.mxu0 %vm709_vm2, %v1013_v31  ;;  %v2980_v58 = vcombine.low %v1467_v57, %v1466_v55  ;;  %v1468_v60 = vcombine.high %v1466_v55, %v1466_v55  ;;  %v4285_v62 = vpop.f32.mrf.mxu1 }
 0x1d3   : > { %4301 = vmatpush3.msra.mxu0 %v3959_v27  ;;  %4308 = vmatprep.mubr.msk.f32.mxu0 %vm340_vm1, %v4768_v21 }
 0x1d4   : > { %4302 = vmatprep.subr.mxu0 %v3958_v34  ;;  %v2988_v63 = vrot.slane %v2980_v58, %v4755_v13  ;;  %v2981_v0 = vcombine.low %v1468_v60, %v5034_v61 }
 0x1d5   : > { %4296 = vmatpush3.xpose.msk.msra.mxu1 %vm709_vm2, %v1347_v35  ;;  %4303 = vmatpush3.msra.mxu0 %v3958_v34 }
 0x1d6   : > { %4311 = vmatprep.subr.mxu1 %v4634_v2  ;;  %4304 = vmatprep.subr.mxu0 %v3957_v37  ;;  %v2995_v1 = vrot.slane %v2981_v0, %v4755_v13 }
 0x1d7   : > { %4305 = vmatpush3.msra.mxu0 %v3957_v37 }
 0x1d8   : > { %4298 = vmatmul.mubr.msk.f32.vlgmr.msra.gmra.mxu1 %vm709_vm2, %v1014_v36  ;;  %4306 = vmatprep.subr.mxu0 %v3956_v41  ;;  %v5039_v3 = vcombine.low %v2988_v63, %v2995_v1  ;;  %v3985_v1 = vld [vmem:[%s5454_s2 + $0x78] sm:$0xff] }
 0x1d9   : > { %4312 = vmatpush3.msra.mxu1 %v3965_v38  ;;  %4319 = vmatprep.mubr.msk.f32.mxu1 %vm4635_vm0, %v4634_v2 }
 0x1da   : > { %4313 = vmatprep.subr.mxu1 %v4634_v2  ;;  %4307 = vmatpush3.msra.mxu0 %v3956_v41 }
 0x1db   : > { %4314 = vmatpush3.msra.mxu1 %v3964_v44  ;;  %4309 = vmatmul.mubr.msk.f32.vlgmr.msra.gmra.mxu0 %vm340_vm1, %v4770_v22 }
 0x1dc   : > { %4315 = vmatprep.subr.mxu1 %v4634_v2  ;;  %4328 = vmatprep.subr.mxu0 %v4634_v2 }
 0x1dd   : > { %4316 = vmatpush3.msra.mxu1 %v3963_v45  ;;  %4336 = vmatprep.mubr.msk.f32.mxu0 %vm4635_vm0, %v4634_v2 }
 0x1de   : > { %4317 = vmatprep.subr.mxu1 %v4634_v2  ;;  %4329 = vmatpush3.msra.mxu0 %v3972_v4 }
 0x1df   : > { %4318 = vmatpush3.msra.mxu1 %v3962_v46  ;;  %4330 = vmatprep.subr.mxu0 %v4634_v2 }
 0x1e0   : > { %4320 = vmatmul.mubr.msk.f32.vlgmr.msra.gmra.mxu1 %vm340_vm1, %v4788_v39  ;;  %4345 = vmatprep.subr.mxu1 %v4634_v2 }
 0x1e1   : > { %4322 = vmatprep.mubr.msk.f32.mxu1 %vm4635_vm0, %v4634_v2  ;;  %4331 = vmatpush3.msra.mxu0 %v3971_v5 }
 0x1e2   : > { %4332 = vmatprep.subr.mxu0 %v4634_v2 }
 0x1e3   : > { %4333 = vmatpush3.msra.mxu0 %v3970_v6 }
 0x1e4   : > { %4323 = vmatmul.mubr.msk.f32.gmra.mxu1 %vm340_vm1, %v4792_v40  ;;  %4334 = vmatprep.subr.mxu0 %v4634_v2 }
 0x1e5   : > { %4325 = vmatprep.mubr.msk.f32.mxu1 %vm4635_vm0, %v4634_v2  ;;  %4335 = vmatpush3.msra.mxu0 %v3969_v7 }
 0x1e6   : > { %4337 = vmatmul.mubr.msk.f32.vlgmr.msra.gmra.mxu0 %vm340_vm1, %v4788_v39  ;;  %4352 = vmatprep.subr.mxu0 %v4634_v2 }
 0x1e7   : > { %4339 = vmatprep.mubr.msk.f32.mxu0 %vm4635_vm0, %v4634_v2 }
 0x1e8   : > { %4326 = vmatmul.mubr.msk.f32.gmra.mxu1 %vm340_vm1, %v4799_v42 }
 0x1e9   : > { %4349 = vmatprep.mubr.msk.f32.mxu1 %vm4635_vm0, %v4634_v2 }
 0x1ea   : > { %4340 = vmatmul.mubr.msk.f32.gmra.mxu0 %vm340_vm1, %v4792_v40 }
 0x1eb   : > { %4342 = vmatprep.mubr.msk.f32.mxu0 %vm4635_vm0, %v4634_v2 }
 0x1ee   : > { %4343 = vmatmul.mubr.msk.f32.gmra.mxu0 %vm340_vm1, %v4799_v42 }
 0x1ef   : > { %4356 = vmatprep.mubr.msk.f32.mxu0 %vm4635_vm0, %v4634_v2 }
 0x23f   : > { %v2568_v8 = vpop.xlane.xlu0 %2567 }
 0x240   : > { %v2590_v9 = vsub.f32 %v4948_v53, %v2568_v8  ;;  %v3984_v8 = vld [vmem:[%s5454_s2 + $0x70] sm:$0xff] }
 0x242   : > { %v2598_v10 = vmul.f32 1.442695, %v2590_v9 }
 0x244   : > { %4540 = vpow2.f32 %v2598_v10 }
 0x245   : > { %v2571_v14 = vpop.xlane.xlu0 %2570 }
 0x246   : > { %v2591_v15 = vsub.f32 %v4952_v56, %v2571_v14  ;;  %v3991_v14 = vld [vmem:[%s5455_s3 + $0x78] sm:$0xff] }
 0x248   : > { %v2600_v16 = vmul.f32 1.442695, %v2591_v15  ;;  %v3982_v15 = vld [vmem:[%s5454_s2 + $0x60] sm:$0xff] }
 0x24a   : > { %4542 = vpow2.f32 %v2600_v16  ;;  %v3989_v16 = vld [vmem:[%s5455_s3 + $0x68] sm:$0xff] }
 0x251   : > { %v5070_v11 = vpop.eup %4540 }
 0x252   : > { %v2614_v12 = vsel %vm2565_vm3, %v5070_v11, 0.0 }
 0x253   : > { %2615 = vadd.xlane.f32.xlu0 %v2614_v12  ;;  %v3983_v12 = vld [vmem:[%s5454_s2 + $0x68] sm:$0xff] }
 0x257   : > { %v5083_v23 = vpop.eup %4542 }
 0x258   : > { %v2617_v56 = vsel %vm2565_vm3, %v5083_v23, 0.0 }
 0x292   : > { %v5075_v17 = vpop.f32.mrf.mxu0 }
 0x293   : > { %v2572_v18 = vsel %vm2565_vm3, %v5075_v17, -inf }
 0x294   : > { %2573 = vmax.xlane.f32.xlu1 %v2572_v18  ;;  %v4292_v53 = vpop.f32.mrf.mxu0  ;;  %v3988_v18 = vld [vmem:[%s5455_s3 + $0x60] sm:$0xff] }
 0x298   : > { %v5079_v19 = vpop.f32.mrf.mxu1 }
 0x299   : > { %v2575_v20 = vsel %vm2565_vm3, %v5079_v19, -inf }
 0x29a   : > { %v4299_v24 = vpop.f32.mrf.mxu1  ;;  %2576 = vmax.xlane.f32.xlu1 %v2575_v20 }
 0x29b   : > { %v4310_v41 = vpop.f32.mrf.mxu0 }
 0x29c   : > { %v1558_v10 = vmul.f32 0.35355338, %v4310_v41  ;;  %v3998_v41 = vld [vmem:[%s5456_s4 + $0x78] sm:$0xff] }
 0x29d   : > { %v1548_v59 = vpop.f32.mrf.mxu0 }
 0x29e   : > { %2618 = vadd.xlane.f32.xlu1 %v2617_v56  ;;  %v1557_v6 = vmul.f32 0.35355338, %v1548_v59 }
 0x2a0   : > { %v1630_v25 = vpop.f32.mrf.mxu1 }
 0x2a1   : > { %v1732_v26 = vcombine.high %v1630_v25, %v1630_v25  ;;  %v1739_v27 = vrot.slane %v1630_v25, %v4755_v13 }
 0x2a2   : > { %v4321_v28 = vpop.f32.mrf.mxu1 }
 0x2a3   : > { %v1746_v30 = vrot.slane %v1732_v26, %v4755_v13  ;;  %v1747_v31 = vcombine.high %v1739_v27, %v1739_v27 }
 0x2a4   : > { %v1635_v32 = vpop.f32.mrf.mxu1 }
 0x2a5   : > { %v1748_v34 = vcombine.high %v1746_v30, %v1746_v30  ;;  %v1774_v35 = vcombine.low %v1739_v27, %v1747_v31  ;;  %v1749_v36 = vcombine.high %v1635_v32, %v1635_v32  ;;  %v1756_v37 = vrot.slane %v1635_v32, %v4755_v13 }
 0x2a6   : > { %v4324_v38 = vpop.f32.mrf.mxu1 }
 0x2a7   : > { %v1775_v44 = vcombine.low %v1746_v30, %v1748_v34  ;;  %v1763_v45 = vrot.slane %v1749_v36, %v4755_v13  ;;  %v1764_v46 = vcombine.high %v1756_v37, %v1756_v37  ;;  %v1797_v49 = vrot.slane %v1756_v37, %v4755_v13 }
 0x2a8   : > { %v1640_v50 = vpop.f32.mrf.mxu1  ;;  %v1782_v51 = vrot.slane %v1774_v35, %v4755_v13 }
 0x2a9   : > { %v1789_v54 = vrot.slane %v1775_v44, %v4755_v13  ;;  %v1765_v55 = vcombine.high %v1763_v45, %v1763_v45  ;;  %v1772_v57 = vrot.slane %v1640_v50, %v4755_v13  ;;  %4346 = vmatpush3.xpose.msk.msra.mxu1 %vm709_vm2, %v1797_v49  ;;  %v1875_v62 = vcombine.low %v1764_v46, %v1763_v45  ;;  %v3997_v44 = vld [vmem:[%s5456_s4 + $0x70] sm:$0xff]  ;;  %v3996_v45 = vld [vmem:[%s5456_s4 + $0x68] sm:$0xff]  ;;  %v3995_v46 = vld [vmem:[%s5456_s4 + $0x60] sm:$0xff] }
 0x2aa   : > { %v4327_v58 = vpop.f32.mrf.mxu1  ;;  %4347 = vmatprep.subr.mxu1 %v4634_v2 }
 0x2ab   : > { %v1790_v60 = vcombine.low %v1782_v51, %v1789_v54  ;;  %v1773_v63 = vcombine.high %v1772_v57, %v1772_v57  ;;  %v1876_v0 = vcombine.low %v1765_v55, %v1772_v57  ;;  %v1883_v7 = vrot.slane %v1875_v62, %v4755_v13 }
 0x2ad   : > { %v1890_v4 = vrot.slane %v1876_v0, %v4755_v13  ;;  %v1898_v5 = vrot.slane %v1773_v63, %v4755_v13  ;;  %4348 = vmatpush3.xpose.msk.msra.mxu1 %vm709_vm2, %v1790_v60 }
 0x2ae   : > { %4359 = vmatprep.subr.mxu1 %v3985_v1 }
 0x2af   : > { %4353 = vmatpush3.xpose.msk.msra.mxu0 %vm709_vm2, %v1898_v5  ;;  %v1891_v9 = vcombine.low %v1883_v7, %v1890_v4  ;;  %v891_v4 = vcombine.high %v4904_v29, %v4904_v29  ;;  %v898_v5 = vrot.slane %v4904_v29, %v4755_v13 }
 0x2b0   : > { %4354 = vmatprep.subr.mxu0 %v4634_v2  ;;  %4350 = vmatmul.mubr.msk.f32.vlgmr.msra.gmra.mxu1 %vm709_vm2, %v1557_v6 }
 0x2b1   : > { %4360 = vmatpush3.msra.mxu1 %v3985_v1  ;;  %4367 = vmatprep.mubr.msk.f32.mxu1 %vm340_vm1, %v4768_v21  ;;  %v3990_v21 = vld [vmem:[%s5455_s3 + $0x70] sm:$0xff] }
 0x2b2   : > { %4361 = vmatprep.subr.mxu1 %v3984_v8 }
 0x2b3   : > { %4355 = vmatpush3.xpose.msk.msra.mxu0 %vm709_vm2, %v1891_v9  ;;  %4362 = vmatpush3.msra.mxu1 %v3984_v8  ;;  %v905_v9 = vrot.slane %v891_v4, %v4755_v13 }
 0x2b4   : > { %4370 = vmatprep.subr.mxu0 %v4634_v2  ;;  %4363 = vmatprep.subr.mxu1 %v3983_v12 }
 0x2b5   : > { %4364 = vmatpush3.msra.mxu1 %v3983_v12 }
 0x2b6   : > { %4357 = vmatmul.mubr.msk.f32.vlgmr.msra.gmra.mxu0 %vm709_vm2, %v1558_v10  ;;  %4365 = vmatprep.subr.mxu1 %v3982_v15  ;;  %v1435_v10 = vcombine.high %v5025_v47, %v5025_v47 }
 0x2b7   : > { %4371 = vmatpush3.msra.mxu0 %v3991_v14  ;;  %4378 = vmatprep.mubr.msk.f32.mxu0 %vm4635_vm0, %v4634_v2 }
 0x2b8   : > { %4372 = vmatprep.subr.mxu0 %v4634_v2  ;;  %4366 = vmatpush3.msra.mxu1 %v3982_v15 }
 0x2b9   : > { %4373 = vmatpush3.msra.mxu0 %v3990_v21  ;;  %4368 = vmatmul.mubr.msk.f32.vlgmr.msra.gmra.mxu1 %vm340_vm1, %v4770_v22  ;;  %v5156_v22 = vpop.f32.mrf.mxu0 }
 0x2ba   : > { %4374 = vmatprep.subr.mxu0 %v4634_v2  ;;  %4387 = vmatprep.subr.mxu1 %v4634_v2 }
 0x2bb   : > { %4375 = vmatpush3.msra.mxu0 %v3989_v16  ;;  %4395 = vmatprep.mubr.msk.f32.mxu1 %vm4635_vm0, %v4634_v2  ;;  %v4338_v53 = vpop.f32.mrf.mxu0  ;;  %v906_v16 = vcombine.high %v898_v5, %v898_v5 }
 0x2bc   : > { %4376 = vmatprep.subr.mxu0 %v4634_v2  ;;  %4388 = vmatpush3.msra.mxu1 %v3998_v41 }
 0x2bd   : > { %4377 = vmatpush3.msra.mxu0 %v3988_v18  ;;  %v1720_v20 = vpop.f32.mrf.mxu0  ;;  %4389 = vmatprep.subr.mxu1 %v4634_v2 }
 0x2be   : > { %4379 = vmatmul.mubr.msk.f32.vlgmr.msra.gmra.mxu0 %vm340_vm1, %v4788_v39  ;;  %4404 = vmatprep.subr.mxu0 %v4634_v2  ;;  %v1996_v24 = vcombine.high %v1720_v20, %v1720_v20  ;;  %v5159_v56 = vrot.slane %v1720_v20, %v4755_v13 }
 0x2bf   : > { %4381 = vmatprep.mubr.msk.f32.mxu0 %vm4635_vm0, %v4634_v2  ;;  %v4341_v25 = vpop.f32.mrf.mxu0  ;;  %4390 = vmatpush3.msra.mxu1 %v3997_v44 }
 0x2c0   : > { %v2010_v26 = vrot.slane %v1996_v24, %v4755_v13  ;;  %v2011_v27 = vcombine.high %v5159_v56, %v5159_v56  ;;  %4391 = vmatprep.subr.mxu1 %v4634_v2  ;;  %v907_v25 = vcombine.high %v905_v9, %v905_v9 }
 0x2c1   : > { %v1725_v30 = vpop.f32.mrf.mxu0  ;;  %4392 = vmatpush3.msra.mxu1 %v3996_v45 }
 0x2c2   : > { %4382 = vmatmul.mubr.msk.f32.gmra.mxu0 %vm340_vm1, %v4792_v40  ;;  %v3344_v28 = vcombine.low %v2011_v27, %v2010_v26  ;;  %v2012_v31 = vcombine.high %v2010_v26, %v2010_v26  ;;  %v5165_v32 = vrot.slane %v1725_v30, %v4755_v13  ;;  %4393 = vmatprep.subr.mxu1 %v4634_v2 }
 0x2c3   : > { %4384 = vmatprep.mubr.msk.f32.mxu0 %vm4635_vm0, %v4634_v2  ;;  %v4344_v34 = vpop.f32.mrf.mxu0  ;;  %4394 = vmatpush3.msra.mxu1 %v3995_v46  ;;  %v1442_v26 = vrot.slane %v5025_v47, %v4755_v13  ;;  %v1449_v27 = vrot.slane %v1435_v10, %v4755_v13 }
 0x2c4   : > { %v3352_v35 = vrot.slane %v3344_v28, %v4755_v13  ;;  %v3345_v36 = vcombine.low %v2012_v31, %v5165_v32  ;;  %4396 = vmatmul.mubr.msk.f32.vlgmr.msra.gmra.mxu1 %vm340_vm1, %v4788_v39  ;;  %4411 = vmatprep.subr.mxu1 %v4634_v2 }
 0x2c5   : > { %4398 = vmatprep.mubr.msk.f32.mxu1 %vm4635_vm0, %v4634_v2 }
 0x2c6   : > { %4385 = vmatmul.mubr.msk.f32.gmra.mxu0 %vm340_vm1, %v4799_v42  ;;  %v3359_v37 = vrot.slane %v3345_v36, %v4755_v13 }
 0x2c7   : > { %4408 = vmatprep.mubr.msk.f32.mxu0 %vm4635_vm0, %v4634_v2 }
 0x2c8   : > { %v5170_v38 = vcombine.low %v3352_v35, %v3359_v37  ;;  %4399 = vmatmul.mubr.msk.f32.gmra.mxu1 %vm340_vm1, %v4792_v40  ;;  %v2678_v37 = vcombine.low %v898_v5, %v906_v16  ;;  %v932_v16 = vcombine.high %v4913_v43, %v4913_v43  ;;  %v2903_v43 = vrot.slane %v5028_v52, %v4755_v13 }
 0x2c9   : > { %4401 = vmatprep.mubr.msk.f32.mxu1 %vm4635_vm0, %v4634_v2 }
 0x2cc   : > { %4402 = vmatmul.mubr.msk.f32.gmra.mxu1 %vm340_vm1, %v4799_v42 }
 0x2cd   : > { %4415 = vmatprep.mubr.msk.f32.mxu1 %vm4635_vm0, %v4634_v2 }
 0x31d   : > { %v2574_v49 = vpop.xlane.xlu1 %2573 }
 0x31e   : > { %v2592_v39 = vsub.f32 %v5075_v17, %v2574_v49  ;;  %v2616_v17 = vpop.xlane.xlu0 %2615 }
 0x320   : > { %v2602_v50 = vmul.f32 1.442695, %v2592_v39 }
 0x322   : > { %4544 = vpow2.f32 %v2602_v50  ;;  %v2679_v50 = vcombine.low %v905_v9, %v907_v25  ;;  %v2802_v25 = vrot.slane %v932_v16, %v4755_v13 }
 0x323   : > { %v2577_v51 = vpop.xlane.xlu1 %2576 }
 0x324   : > { %v2593_v54 = vsub.f32 %v5079_v19, %v2577_v51  ;;  %v1450_v51 = vcombine.high %v1442_v26, %v1442_v26 }
 0x326   : > { %v2604_v55 = vmul.f32 1.442695, %v2593_v54  ;;  %v1451_v54 = vcombine.high %v1449_v27, %v1449_v27  ;;  %v2880_v9 = vcombine.low %v1442_v26, %v1450_v51  ;;  %v1476_v26 = vcombine.high %v5034_v61, %v5034_v61 }
 0x327   : > { %v2619_v63 = vpop.xlane.xlu1 %2618 }
 0x328   : > { %4546 = vpow2.f32 %v2604_v55  ;;  %v2881_v10 = vcombine.low %v1449_v27, %v1451_v54  ;;  %v3003_v61 = vrot.slane %v1476_v26, %v4755_v13 }
 0x329   : > { %4548 = vrcp.f32 %v2616_v17 }
 0x32a   : > { %4550 = vrcp.f32 %v2619_v63 }
 0x32f   : > { %v5202_v40 = vpop.eup %4544 }
 0x330   : > { %v2620_v57 = vsel %vm2565_vm3, %v5202_v40, 0.0 }
 0x331   : > { %2621 = vadd.xlane.f32.xlu0 %v2620_v57 }
 0x335   : > { %v5206_v42 = vpop.eup %4546 }
 0x336   : > { %v2623_v58 = vsel %vm2565_vm3, %v5206_v42, 0.0  ;;  %v4549_v14 = vpop.eup %4548 }
 0x337   : > { %2624 = vadd.xlane.f32.xlu1 %v2623_v58  ;;  %v2646_v28 = vmul.f32 %v4549_v14, %v2616_v17  ;;  %v4551_v45 = vpop.eup %4550 }
 0x339   : > { %v2654_v55 = vsub.f32 2.0, %v2646_v28 }
 0x370   : > { %v5210_v59 = vpop.f32.mrf.mxu1 }
 0x371   : > { %v2578_v19 = vsel %vm2565_vm3, %v5210_v59, -inf }
 0x372   : > { %2579 = vmax.xlane.f32.xlu0 %v2578_v19  ;;  %v4351_v60 = vpop.f32.mrf.mxu1 }
 0x376   : > { %v5214_v62 = vpop.f32.mrf.mxu0 }
 0x377   : > { %v2581_v0 = vsel %vm2565_vm3, %v5214_v62, -inf }
 0x378   : > { %2582 = vmax.xlane.f32.xlu1 %v2581_v0  ;;  %v4358_v1 = vpop.f32.mrf.mxu0 }
 0x379   : > { %v4369_v31 = vpop.f32.mrf.mxu1  ;;  %v2647_v1 = vmul.f32 %v4551_v45, %v2619_v63  ;;  %v2701_v63 = vrot.slane %v4907_v33, %v4755_v13 }
 0x37b   : > { %v2092_v58 = vpop.f32.mrf.mxu1 }
 0x37e   : > { %v2174_v6 = vpop.f32.mrf.mxu0 }
 0x37f   : > { %v2276_v7 = vcombine.high %v2174_v6, %v2174_v6  ;;  %v2283_v8 = vrot.slane %v2174_v6, %v4755_v13  ;;  %v2101_v6 = vmul.f32 0.35355338, %v2092_v58 }
 0x380   : > { %v4380_v12 = vpop.f32.mrf.mxu0 }
 0x381   : > { %v2290_v15 = vrot.slane %v2276_v7, %v4755_v13  ;;  %v2291_v21 = vcombine.high %v2283_v8, %v2283_v8  ;;  %v2686_v7 = vrot.slane %v2678_v37, %v4755_v13  ;;  %v2662_v12 = vmul.f32 %v4549_v14, %v2654_v55 }
 0x382   : > { %v2179_v18 = vpop.f32.mrf.mxu0  ;;  %v2888_v14 = vrot.slane %v2880_v9, %v4755_v13 }
 0x383   : > { %v2292_v53 = vcombine.high %v2290_v15, %v2290_v15  ;;  %v2318_v20 = vcombine.low %v2283_v8, %v2291_v21  ;;  %v2293_v24 = vcombine.high %v2179_v18, %v2179_v18  ;;  %v2300_v29 = vrot.slane %v2179_v18, %v4755_v13 }
 0x384   : > { %v4383_v30 = vpop.f32.mrf.mxu0  ;;  %v2693_v8 = vrot.slane %v2679_v50, %v4755_v13  ;;  %v2655_v21 = vsub.f32 2.0, %v2647_v1  ;;  %v2670_v33 = vmul.f32 %v5070_v11, %v2662_v12  ;;  %v5287_v27 = vpop.f32.mrf.mxu1 }
 0x385   : > { %v2319_v34 = vcombine.low %v2290_v15, %v2292_v53  ;;  %v2307_v35 = vrot.slane %v2293_v24, %v4755_v13  ;;  %v2308_v36 = vcombine.high %v2300_v29, %v2300_v29  ;;  %v2341_v41 = vrot.slane %v2300_v29, %v4755_v13 }
 0x386   : > { %v2184_v44 = vpop.f32.mrf.mxu0  ;;  %v2326_v46 = vrot.slane %v2318_v20, %v4755_v13  ;;  %v2895_v53 = vrot.slane %v2881_v10, %v4755_v13  ;;  %v2694_v20 = vcombine.low %v2686_v7, %v2693_v8  ;;  %v2663_v24 = vmul.f32 %v4551_v45, %v2655_v21  ;;  %v4397_v28 = vpop.f32.mrf.mxu1 }
 0x387   : > { %v2333_v49 = vrot.slane %v2319_v34, %v4755_v13  ;;  %v2309_v39 = vcombine.high %v2307_v35, %v2307_v35  ;;  %v2316_v47 = vrot.slane %v2184_v44, %v4755_v13  ;;  %4405 = vmatpush3.xpose.msk.msra.mxu0 %vm709_vm2, %v2341_v41  ;;  %v2419_v19 = vcombine.low %v2308_v36, %v2307_v35 }
 0x388   : > { %v4386_v57 = vpop.f32.mrf.mxu0  ;;  %4406 = vmatprep.subr.mxu0 %v4634_v2  ;;  %v2102_v29 = vmul.f32 0.35355338, %v4369_v31  ;;  %v2896_v11 = vcombine.low %v2888_v14, %v2895_v53  ;;  %v2671_v52 = vmul.f32 %v5083_v23, %v2663_v24  ;;  %v2264_v31 = vpop.f32.mrf.mxu1 }
 0x389   : > { %v2334_v17 = vcombine.low %v2326_v46, %v2333_v49  ;;  %v2317_v60 = vcombine.high %v2316_v47, %v2316_v47  ;;  %v2420_v0 = vcombine.low %v2309_v39, %v2316_v47  ;;  %v2427_v15 = vrot.slane %v2419_v19, %v4755_v13 }
 0x38a   : > { %v2540_v35 = vcombine.high %v2264_v31, %v2264_v31  ;;  %v5290_v36 = vrot.slane %v2264_v31, %v4755_v13  ;;  %v4400_v37 = vpop.f32.mrf.mxu1  ;;  %v3267_v31 = vrot.slane %v5159_v56, %v4755_v13  ;;  %v2523_v56 = vcombine.high %v5287_v27, %v5287_v27 }
 0x38b   : > { %v2434_v4 = vrot.slane %v2420_v0, %v4755_v13  ;;  %v2442_v5 = vrot.slane %v2317_v60, %v4755_v13  ;;  %4407 = vmatpush3.xpose.msk.msra.mxu0 %vm709_vm2, %v2334_v17 }
 0x38c   : > { %4418 = vmatprep.subr.mxu0 %v4634_v2  ;;  %v2554_v44 = vrot.slane %v2540_v35, %v4755_v13  ;;  %v2269_v47 = vpop.f32.mrf.mxu1 }
 0x38d   : > { %4412 = vmatpush3.xpose.msk.msra.mxu1 %vm709_vm2, %v2442_v5  ;;  %v2435_v18 = vcombine.low %v2427_v15, %v2434_v4  ;;  %v5297_v54 = vrot.slane %v2269_v47, %v4755_v13 }
 0x38e   : > { %4413 = vmatprep.subr.mxu1 %v4634_v2  ;;  %4409 = vmatmul.mubr.msk.f32.vlgmr.msra.gmra.mxu0 %vm709_vm2, %v2101_v6  ;;  %v2556_v50 = vcombine.high %v2554_v44, %v2554_v44  ;;  %v4403_v57 = vpop.f32.mrf.mxu1 }
 0x38f   : > { %4419 = vmatpush3.msk.msra.mxu0 %vm2706_vm4, %v2701_v63  ;;  %4422 = vmatprep.mubr.msk.f32.mxu0 %vm4635_vm0, %v4634_v2 }
 0x390   : > { %4420 = vmatprep.subr.mxu0 %v4634_v2  ;;  %v3630_v17 = vcombine.low %v2556_v50, %v5297_v54 }
 0x391   : > { %4414 = vmatpush3.xpose.msk.msra.mxu1 %vm709_vm2, %v2435_v18  ;;  %4421 = vmatpush3.msra.mxu0 %v2694_v20  ;;  %v2020_v18 = vcombine.high %v5165_v32, %v5165_v32  ;;  %v1979_v32 = vcombine.high %v5156_v22, %v5156_v22 }
 0x392   : > { %4425 = vmatprep.subr.mxu1 %v4634_v2  ;;  %4423 = vmatmul.mubr.msk.f32.vlgmr.msra.gmra.mxu0 %vm2565_vm3, %v2670_v33  ;;  %v3644_v60 = vrot.slane %v3630_v17, %v4755_v13 }
 0x393   : > { %4432 = vmatprep.subr.mxu0 %v4634_v2  ;;  %4436 = vmatprep.mubr.msk.f32.mxu0 %vm4635_vm0, %v4634_v2  ;;  %v1993_v26 = vrot.slane %v1979_v32, %v4755_v13 }
 0x394   : > { %4433 = vmatpush3.msk.msra.mxu0 %vm2706_vm4, %v2903_v43  ;;  %4416 = vmatmul.mubr.msk.f32.vlgmr.msra.gmra.mxu1 %vm709_vm2, %v2102_v29  ;;  %v3367_v43 = vrot.slane %v2020_v18, %v4755_v13 }
 0x395   : > { %4434 = vmatprep.subr.mxu0 %v4634_v2  ;;  %4426 = vmatpush3.msk.msra.mxu1 %vm2706_vm4, %v2802_v25  ;;  %v1986_v25 = vrot.slane %v5156_v22, %v4755_v13 }
 0x396   : > { %4435 = vmatpush3.msra.mxu0 %v2896_v11  ;;  %4427 = vmatprep.subr.mxu1 %v4634_v2 }
 0x397   : > { %4428 = vmatpush3.msra.mxu1 %v4918_v48  ;;  %4429 = vmatprep.mubr.msk.f32.mxu1 %vm4635_vm0, %v4634_v2  ;;  %v1994_v11 = vcombine.high %v1986_v25, %v1986_v25 }
 0x398   : > { %4430 = vmatmul.mubr.msk.f32.vlgmr.msra.gmra.mxu1 %vm2565_vm3, %v2671_v52  ;;  %4439 = vmatprep.subr.mxu1 %v4634_v2  ;;  %v1995_v52 = vcombine.high %v1993_v26, %v1993_v26 }
 0x399   : > { %4440 = vmatpush3.msk.msra.mxu1 %vm2706_vm4, %v3003_v61  ;;  %4443 = vmatprep.mubr.msk.f32.mxu1 %vm4635_vm0, %v4634_v2  ;;  %v3244_v61 = vcombine.low %v1986_v25, %v1994_v11 }
 0x39a   : > { %4441 = vmatprep.subr.mxu1 %v4634_v2 }
 0x39b   : > { %4442 = vmatpush3.msra.mxu1 %v5039_v3  ;;  %v2555_v3 = vcombine.high %v5290_v36, %v5290_v36 }
 0x39d   : > { %v3629_v39 = vcombine.low %v2555_v3, %v2554_v44  ;;  %v2530_v44 = vrot.slane %v5287_v27, %v4755_v13  ;;  %v2537_v3 = vrot.slane %v2523_v56, %v4755_v13 }
 0x39f   : > { %v3637_v58 = vrot.slane %v3629_v39, %v4755_v13  ;;  %v2539_v39 = vcombine.high %v2537_v3, %v2537_v3 }
 0x3a1   : > { %v5307_v1 = vcombine.low %v3637_v58, %v3644_v60  ;;  %v3530_v58 = vcombine.low %v2537_v3, %v2539_v39 }
 0x3ba   : > { %v2622_v48 = vpop.xlane.xlu0 %2621 }
 0x3bb   : > { %4552 = vrcp.f32 %v2622_v48 }
 0x3c0   : > { %v2625_v23 = vpop.xlane.xlu1 %2624 }
 0x3c1   : > { %4554 = vrcp.f32 %v2625_v23 }
 0x3c8   : > { %v4553_v30 = vpop.eup %4552 }
 0x3c9   : > { %v2648_v34 = vmul.f32 %v4553_v30, %v2622_v48  ;;  %v3245_v48 = vcombine.low %v1993_v26, %v1995_v52 }
 0x3cb   : > { %v2656_v41 = vsub.f32 2.0, %v2648_v34 }
 0x3cd   : > { %v2664_v46 = vmul.f32 %v4553_v30, %v2656_v41  ;;  %v3259_v30 = vrot.slane %v3245_v48, %v4755_v13 }
 0x3ce   : > { %v4555_v45 = vpop.eup %4554 }
 0x3cf   : > { %v2649_v49 = vmul.f32 %v4555_v45, %v2625_v23  ;;  %v2672_v51 = vmul.f32 %v5202_v40, %v2664_v46  ;;  %v2879_v40 = vld [vmem:[%s5457_s5] sm:$0xff] }
 0x3d0   : > { %4451 = vmatprep.subr.mxu1 %v2879_v40 }
 0x3d1   : > { %v2657_v55 = vsub.f32 2.0, %v2649_v49  ;;  %4437 = vmatmul.mubr.msk.f32.vlgmr.msra.gmra.mxu0 %vm2565_vm3, %v2672_v51  ;;  %v2538_v49 = vcombine.high %v2530_v44, %v2530_v44 }
 0x3d3   : > { %v2665_v19 = vmul.f32 %v4555_v45, %v2657_v55  ;;  %v3529_v57 = vcombine.low %v2530_v44, %v2538_v49 }
 0x3d5   : > { %v2673_v0 = vmul.f32 %v5206_v42, %v2665_v19  ;;  %v3537_v27 = vrot.slane %v3529_v57, %v4755_v13 }
 0x3d7   : > { %4444 = vmatmul.mubr.msk.f32.vlgmr.msra.gmra.mxu1 %vm2565_vm3, %v2673_v0  ;;  %v3544_v0 = vrot.slane %v3530_v58, %v4755_v13 }
 0x3d8   : > { %4452 = vmatpush3.msra.mxu1 %v2879_v40 }
 0x3d9   : > { %4463 = vmatprep.subr.mxu1 %v4634_v2 }
 0x3fb   : > { %v2580_v4 = vpop.xlane.xlu0 %2579 }
 0x3fc   : > { %v2594_v5 = vsub.f32 %v5210_v59, %v2580_v4  ;;  %v4016_v59 = vld [vmem:[%s5457_s5 + $0x8] sm:$0xff]  ;;  %v3552_v4 = vrot.slane %v5290_v36, %v4755_v13 }
 0x3fd   : > { %4446 = vmatprep.subr.mxu0 %v4016_v59 }
 0x3fe   : > { %v2606_v6 = vmul.f32 1.442695, %v2594_v5  ;;  %4447 = vmatpush3.msra.mxu0 %v4016_v59  ;;  %v3545_v5 = vcombine.low %v3537_v27, %v3544_v0 }
 0x3ff   : > { %4456 = vmatprep.subr.mxu0 %v4634_v2 }
 0x400   : > { %4556 = vpow2.f32 %v2606_v6 }
 0x401   : > { %v2583_v7 = vpop.xlane.xlu1 %2582 }
 0x402   : > { %v2595_v42 = vsub.f32 %v5214_v62, %v2583_v7 }
 0x404   : > { %v2608_v8 = vmul.f32 1.442695, %v2595_v42 }
 0x406   : > { %4558 = vpow2.f32 %v2608_v8 }
 0x40d   : > { %v5313_v9 = vpop.eup %4556 }
 0x40e   : > { %v2626_v10 = vsel %vm2565_vm3, %v5313_v9, 0.0 }
 0x40f   : > { %2627 = vadd.xlane.f32.xlu0 %v2626_v10 }
 0x413   : > { %v5317_v12 = vpop.eup %4558 }
 0x414   : > { %v2629_v15 = vsel %vm2565_vm3, %v5317_v12, 0.0 }
 0x415   : > { %2630 = vadd.xlane.f32.xlu1 %v2629_v15 }
 0x44e   : > { %v5325_v62 = vpop.f32.mrf.mxu0 }
 0x44f   : > { %v2584_v63 = vsel %vm2565_vm3, %v5325_v62, -inf }
 0x450   : > { %2585 = vmax.xlane.f32.xlu0 %v2584_v63  ;;  %v4410_v21 = vpop.f32.mrf.mxu0  ;;  %v4025_v63 = vld [vmem:[%s5457_s5 + $0x10] sm:$0xff] }
 0x452   : > { %v2775_v16 = vpop.f32.mrf.mxu0 }
 0x453   : > { %4453 = vmatprep.mubr.msk.f32.mxu1 %vm709_vm2, %v2775_v16 }
 0x454   : > { %v5332_v14 = vpop.f32.mrf.mxu1  ;;  %v4424_v53 = vpop.f32.mrf.mxu0 }
 0x455   : > { %v2587_v20 = vsel %vm2565_vm3, %v5332_v14, -inf }
 0x456   : > { %2588 = vmax.xlane.f32.xlu1 %v2587_v20  ;;  %v4417_v33 = vpop.f32.mrf.mxu1 }
 0x457   : > { %v2564_v33 = vcombine.high %v5297_v54, %v5297_v54 }
 0x458   : > { %v2875_v24 = vpop.f32.mrf.mxu1 }
 0x459   : > { %4454 = vmatmul.mubr.msk.f32.vlgmr.msra.gmra.mxu1 %vm709_vm2, %v2875_v24  ;;  %v3652_v24 = vrot.slane %v2564_v33, %v4755_v13 }
 0x45a   : > { %4464 = vmatpush3.msk.msra.mxu1 %vm2706_vm4, %v3367_v43  ;;  %v4431_v29 = vpop.f32.mrf.mxu1  ;;  %4467 = vmatprep.mubr.msk.f32.mxu1 %vm4635_vm0, %v4634_v2 }
 0x45b   : > { %4465 = vmatprep.subr.mxu1 %v4634_v2 }
 0x45c   : > { %4466 = vmatpush3.msra.mxu1 %v5170_v38  ;;  %v3252_v38 = vrot.slane %v3244_v61, %v4755_v13 }
 0x45d   : > { %4475 = vmatprep.subr.mxu1 %v4634_v2 }
 0x45e   : > { %v3260_v37 = vcombine.low %v3252_v38, %v3259_v30 }
 0x491   : > { %v2976_v23 = vpop.f32.mrf.mxu0 }
 0x492   : > { %4448 = vmatprep.mubr.msk.f32.mxu0 %vm709_vm2, %v2976_v23 }
 0x493   : > { %v4438_v28 = vpop.f32.mrf.mxu0 }
 0x497   : > { %v3076_v34 = vpop.f32.mrf.mxu1 }
 0x498   : > { %4449 = vmatmul.mubr.msk.f32.vlgmr.msra.gmra.mxu0 %vm709_vm2, %v3076_v34  ;;  %v2628_v22 = vpop.xlane.xlu0 %2627 }
 0x499   : > { %4457 = vmatpush3.msk.msra.mxu0 %vm2706_vm4, %v3267_v31  ;;  %v4445_v35 = vpop.f32.mrf.mxu1  ;;  %4460 = vmatprep.mubr.msk.f32.mxu0 %vm4635_vm0, %v4634_v2  ;;  %4560 = vrcp.f32 %v2628_v22 }
 0x49a   : > { %4458 = vmatprep.subr.mxu0 %v4634_v2 }
 0x49b   : > { %4459 = vmatpush3.msra.mxu0 %v3260_v37 }
 0x49c   : > { %4470 = vmatprep.subr.mxu0 %v4025_v63 }
 0x49e   : > { %v2631_v41 = vpop.xlane.xlu1 %2630 }
 0x49f   : > { %4562 = vrcp.f32 %v2631_v41 }
 0x4a6   : > { %v4561_v45 = vpop.eup %4560 }
 0x4a7   : > { %v2650_v46 = vmul.f32 %v4561_v45, %v2628_v22 }
 0x4a9   : > { %v2658_v47 = vsub.f32 2.0, %v2650_v46 }
 0x4ab   : > { %v2666_v51 = vmul.f32 %v4561_v45, %v2658_v47 }
 0x4ac   : > { %v4563_v50 = vpop.eup %4562 }
 0x4ad   : > { %v2651_v55 = vmul.f32 %v4563_v50, %v2631_v41  ;;  %v2674_v17 = vmul.f32 %v5313_v9, %v2666_v51 }
 0x4af   : > { %v2659_v19 = vsub.f32 2.0, %v2651_v55  ;;  %4461 = vmatmul.mubr.msk.f32.vlgmr.msra.gmra.mxu0 %vm2565_vm3, %v2674_v17 }
 0x4b0   : > { %4471 = vmatpush3.msra.mxu0 %v4025_v63 }
 0x4b1   : > { %v2667_v60 = vmul.f32 %v4563_v50, %v2659_v19  ;;  %4482 = vmatprep.subr.mxu0 %v4634_v2 }
 0x4b3   : > { %v2675_v40 = vmul.f32 %v5317_v12, %v2667_v60 }
 0x4b5   : > { %4468 = vmatmul.mubr.msk.f32.vlgmr.msra.gmra.mxu1 %vm2565_vm3, %v2675_v40 }
 0x4b6   : > { %4476 = vmatpush3.msk.msra.mxu1 %vm2706_vm4, %v3552_v4  ;;  %4479 = vmatprep.mubr.msk.f32.mxu1 %vm4635_vm0, %v4634_v2 }
 0x4b7   : > { %4477 = vmatprep.subr.mxu1 %v4634_v2 }
 0x4b8   : > { %4478 = vmatpush3.msra.mxu1 %v3545_v5 }
 0x4d9   : > { %v2586_v6 = vpop.xlane.xlu0 %2585 }
 0x4da   : > { %v2596_v7 = vsub.f32 %v5325_v62, %v2586_v6 }
 0x4dc   : > { %v2610_v42 = vmul.f32 1.442695, %v2596_v7 }
 0x4de   : > { %4564 = vpow2.f32 %v2610_v42 }
 0x4df   : > { %v2589_v8 = vpop.xlane.xlu1 %2588 }
 0x4e0   : > { %v2597_v9 = vsub.f32 %v5332_v14, %v2589_v8 }
 0x4e2   : > { %v2612_v36 = vmul.f32 1.442695, %v2597_v9 }
 0x4e4   : > { %4566 = vpow2.f32 %v2612_v36 }
 0x4eb   : > { %v4565_v10 = vpop.eup %4564 }
 0x4ec   : > { %v2632_v12 = vsel %vm2565_vm3, %v4565_v10, 0.0 }
 0x4ed   : > { %2633 = vadd.xlane.f32.xlu0 %v2632_v12 }
 0x4f1   : > { %v4567_v15 = vpop.eup %4566 }
 0x4f2   : > { %v2635_v59 = vsel %vm2565_vm3, %v4567_v15, 0.0 }
 0x4f3   : > { %2636 = vadd.xlane.f32.xlu1 %v2635_v59 }
 0x519   : > { %v4455_v62 = vpop.f32.mrf.mxu1 }
 0x51b   : > { %v3235_v18 = vpop.f32.mrf.mxu1 }
 0x558   : > { %v4450_v21 = vpop.f32.mrf.mxu0 }
 0x559   : > { %v3241_v16 = vadd.f32 %v4455_v62, %v4450_v21 }
 0x55a   : > { %v3154_v14 = vpop.f32.mrf.mxu0 }
 0x55b   : > { %v3236_v53 = vadd.f32 %v3235_v18, %v3154_v14 }
 0x56f   : > { %v3340_v20 = vpop.f32.mrf.mxu0 }
 0x570   : > { %4472 = vmatprep.mubr.msk.f32.mxu0 %vm709_vm2, %v3340_v20 }
 0x571   : > { %v4462_v43 = vpop.f32.mrf.mxu0 }
 0x575   : > { %v3440_v29 = vpop.f32.mrf.mxu1 }
 0x576   : > { %4473 = vmatmul.mubr.msk.f32.vlgmr.msra.gmra.mxu0 %vm709_vm2, %v3440_v29  ;;  %v2634_v32 = vpop.xlane.xlu0 %2633 }
 0x577   : > { %4483 = vmatpush3.msk.msra.mxu0 %vm2706_vm4, %v3652_v24  ;;  %v4469_v25 = vpop.f32.mrf.mxu1  ;;  %4486 = vmatprep.mubr.msk.f32.mxu0 %vm4635_vm0, %v4634_v2  ;;  %4568 = vrcp.f32 %v2634_v32 }
 0x578   : > { %4484 = vmatprep.subr.mxu0 %v4634_v2  ;;  %v4032_v2 = vld [vmem:[%s5457_s5 + $0x18] sm:$0xff] }
 0x579   : > { %4485 = vmatpush3.msra.mxu0 %v5307_v1  ;;  %4489 = vmatprep.subr.mxu1 %v4032_v2 }
 0x57c   : > { %v2637_v54 = vpop.xlane.xlu1 %2636 }
 0x57d   : > { %4570 = vrcp.f32 %v2637_v54 }
 0x584   : > { %v4569_v26 = vpop.eup %4568 }
 0x585   : > { %v2652_v11 = vmul.f32 %v4569_v26, %v2634_v32 }
 0x587   : > { %v2660_v13 = vsub.f32 2.0, %v2652_v11 }
 0x589   : > { %v2668_v61 = vmul.f32 %v4569_v26, %v2660_v13 }
 0x58a   : > { %v4571_v52 = vpop.eup %4570 }
 0x58b   : > { %v2653_v48 = vmul.f32 %v4571_v52, %v2637_v54  ;;  %v2676_v23 = vmul.f32 %v4565_v10, %v2668_v61 }
 0x58d   : > { %v2661_v28 = vsub.f32 2.0, %v2653_v48  ;;  %4480 = vmatmul.mubr.msk.f32.vlgmr.msra.gmra.mxu1 %vm2565_vm3, %v2676_v23 }
 0x58e   : > { %4490 = vmatpush3.msra.mxu1 %v4032_v2 }
 0x58f   : > { %v2669_v38 = vmul.f32 %v4571_v52, %v2661_v28 }
 0x591   : > { %v2677_v30 = vmul.f32 %v4567_v15, %v2669_v38 }
 0x593   : > { %4487 = vmatmul.mubr.msk.f32.vlgmr.msra.gmra.mxu0 %vm2565_vm3, %v2677_v30 }
 0x636   : > { %v4474_v1 = vpop.f32.mrf.mxu0 }
 0x637   : > { %v3528_v31 = vadd.f32 %v4474_v1, %v3241_v16 }
 0x638   : > { %v3518_v34 = vpop.f32.mrf.mxu0 }
 0x639   : > { %v3527_v22 = vadd.f32 %v3518_v34, %v3236_v53 }
 0x64d   : > { %v3625_v35 = vpop.f32.mrf.mxu1 }
 0x64e   : > { %4491 = vmatprep.mubr.msk.f32.mxu1 %vm709_vm2, %v3625_v35 }
 0x64f   : > { %v4481_v37 = vpop.f32.mrf.mxu1 }
 0x653   : > { %v3725_v41 = vpop.f32.mrf.mxu0 }
 0x654   : > { %4492 = vmatmul.mubr.msk.f32.vlgmr.msra.gmra.mxu1 %vm709_vm2, %v3725_v41 }
 0x655   : > { %v4488_v56 = vpop.f32.mrf.mxu0 }
 0x714   : > { %v4493_v44 = vpop.f32.mrf.mxu1 }
 0x715   : > { %v3813_v3 = vadd.f32 %v4493_v44, %v3528_v31 }
 0x716   : > { %v3803_v45 = vpop.f32.mrf.mxu1 }
 0x717   : > { %3815 = vst.msk [vmem:[%s263_s19 + $0x8] sm:$0xff] %vm340_vm1, %v3813_v3  ;;  %v3812_v46 = vadd.f32 %v3803_v45, %v3527_v22 }
 0x719   : > { %3814 = vst.msk [vmem:[%s263_s19] sm:$0xff] %vm340_vm1, %v3812_v46 }
 0x71a   : > { %4585 = shalt.err (!%p4582_p3)
}
 0x71b   : > { %s4586_s15 = scalar_lea.hbm %s5409_s9, 256  ;;  %s4590_s18 = scalar_lea.hbm %s5458_s6, 512 }
 0x71c   : > { %p4587_p4 = scmp.ne.s32.totalorder %s5409_s9, %s4586_s15  ;;  %p4591_p9 = scmp.lt.s32.totalorder %s5409_s9, %s5458_s6 }
 0x71d   : > { %p4592_p10 = scmp.lt.s32.totalorder %s4590_s18, %s4586_s15 }
 0x71e   : > { %p4588_p7 = pnand %p4587_p4, %p4713_p5 }
 0x71f   : > { %p4593_p11 = por %p4592_p10, %p4591_p9 }
 0x720   : > { %p4589_p8 = pneg %p4588_p7 }
 0x722   : > { %p4594_p12 = pnand %p4593_p11, %p4589_p8 }
 0x724   : > { %4597 = shalt.err (!%p4594_p12)
}
 0x725   : > { %s4638_s26 = smov 128   ;;  %s4639_s28 = smov 8  }
 0x726   : > { %4494 = dma.vmem_to_hbm [thread:$0]  (%p4713_p5), %s5403_s20, 256, %s5409_s9, %s5412_s10, %s4638_s26, %s4638_s26, %s4639_s28  }
 0x727 PF: > { %p4500_p13 = scmp.ge.s32.totalorder %s4632_s24, 2  ;;  %s3845_s29 = sand.u32 1, %s4620_s21  }
 0x728   : > { %s3846_s25 = scalar_lea.sflag [#allocation3], %s3845_s29 }
 0x729   : > { %p4497_p0 = pnand %p4500_p13, %p4717_p6 }
 0x72b   : > { %p4498_p1 = pneg %p4497_p0 }
 0x72d   : > { %4615 = dma.done.wait (%p4498_p1), %s3846_s25, 256  }
 0x72e   : > { %4617 = vsyncadd (%p4498_p1), %s3846_s25, 4294967040  ;;  %p16_p2 = scmp.ge.s32.totalorder %s4700_s27, 4   ;;  %s5461_s21 = smov %s4624_s22 }
 0x72f   : > { %s5462_s22 = smov %s4628_s23  ;;  %s5463_s23 = smov %s4711_s30 }
 0x730   : > { %s5464_s24 = smov %s4700_s27  ;;  %18 = sbr.rel (!%p16_p2) target bundleno = 3 (0x3), region = 94 }
 0x735   :  { %3851 = vsyncpa [#allocation3], 1 }
 0x736   :  { %3853 = vsyncpa [#allocation3 + $0x1], 1 }

</bundles_post_ra>
